<compile_context>
chip_gen: v5e
topology: v5e:2x2
jax: 0.10.0
libtpu: 0.0.40
codegen_flags: <defaults>
</compile_context>

<pallas_src>
from functools import partial

import jax
import jax.numpy as jnp
import numpy as np
from jax.experimental import pallas as pl
from jax.experimental.pallas import tpu as pltpu


# ---------------------------------------------------------------------------
# In-kernel math helpers (VPU/EUP only; no cross-lane work)
# ---------------------------------------------------------------------------

def _recip(x):
    # EUP approximate reciprocal + one Newton-Raphson step (~f32 accurate).
    r = pl.reciprocal(x, approx=True)
    return r * (2.0 - x * r)


def _erf_f32(x):
    # erfc rational/exp approximation (Numerical Recipes 6.2), |err| < 1.2e-7,
    # matching torch.nn.GELU()'s exact erf variant to f32 precision.
    a = jnp.abs(x)
    # approx recip + NR keeps the divide error well inside the erf budget.
    t = _recip(1.0 + 0.5 * a)
    poly = -1.26551223 + t * (1.00002368 + t * (0.37409196 + t * (0.09678418
           + t * (-0.18628806 + t * (0.27886807 + t * (-1.13520398
           + t * (1.48851587 + t * (-0.82215223 + t * 0.17087277))))))))
    erfc = t * jnp.exp(-a * a + poly)
    return jnp.where(x >= 0.0, 1.0 - erfc, erfc - 1.0)


def _gelu_exact(x):
    # torch.nn.GELU() default = exact (erf) variant.
    return 0.5 * x * (1.0 + _erf_f32(x * 0.7071067811865476))


_TAN_PI_8 = 0.41421356237309503
_PI = 3.141592653589793
_PI_2 = 1.5707963267948966
_PI_4 = 0.7853981633974483


def _atan2(y, x):
    # Hand-rolled atan2: |min|/|max| quotient via EUP reciprocal, cephes atanf
    # minimax poly on the reduced range, then quadrant fixups. |err| ~ 1e-7.
    ax = jnp.abs(x)
    ay = jnp.abs(y)
    mn = jnp.minimum(ax, ay)
    mx = jnp.maximum(ax, ay)
    q = mn * _recip(jnp.maximum(mx, 1e-30))                      # in [0, 1]
    u2 = (mn - mx) * _recip(jnp.maximum(mn + mx, 1e-30))         # = (q-1)/(q+1)
    big = q > _TAN_PI_8
    u = jnp.where(big, u2, q)
    z = u * u
    p = (((8.05374449538e-2 * z - 1.38776856032e-1) * z + 1.99777106478e-1) * z
         - 3.33329491539e-1) * z * u + u
    base = jnp.where(big, p + _PI_4, p)                 # atan(min/max)
    base = jnp.where(ay > ax, _PI_2 - base, base)       # first-quadrant angle
    base = jnp.where(x < 0.0, _PI - base, base)
    return jnp.where(y < 0.0, -base, base)


_TWO_OVER_PI = 0.6366197723675814
_PIO2_HI = 1.5707963705062866        # float32(pi/2)
_PIO2_LO = -4.371139000186243e-08    # pi/2 - _PIO2_HI


def _sincos(x):
    # Shared range reduction: k = round(x * 2/pi), r = x - k*pi/2 (Cody-Waite),
    # then one sin-poly + one cos-poly + quadrant selects (cephes sinf/cosf).
    kf = jnp.floor(x * _TWO_OVER_PI + 0.5)
    r = x - kf * _PIO2_HI
    r = r - kf * _PIO2_LO
    z = r * r
    s = ((-1.9515295891e-4 * z + 8.3321608736e-3) * z - 1.6666654611e-1) * z * r + r
    c = ((2.443315711809948e-5 * z - 1.388731625493765e-3) * z
         + 4.166664568298827e-2) * z * z - 0.5 * z + 1.0
    ki = kf.astype(jnp.int32)
    swap = (ki & 1) == 1
    sin_neg = (ki & 2) == 2
    cos_neg = ((ki + 1) & 2) == 2
    sinv = jnp.where(swap, c, s)
    sinv = jnp.where(sin_neg, -sinv, sinv)
    cosv = jnp.where(swap, s, c)
    cosv = jnp.where(cos_neg, -cosv, cosv)
    return cosv, sinv


def _conv1x1(v, w_ref, b_ref):
    # 1x1 Conv2d as unrolled VPU broadcast-FMA (no MXU).
    #   v:     (Cin, T) value, pixels on the lane axis.
    #   w_ref: (Cin, Cout, 1) VMEM -> w_ref[i] is the (Cout, 1) weight column.
    #   b_ref: (Cout, 1) VMEM.
    cin = w_ref.shape[0]
    acc = b_ref[...] + w_ref[0] * v[0:1, :]
    for i in range(1, cin):
        acc = acc + w_ref[i] * v[i:i + 1, :]
    return acc


# ---------------------------------------------------------------------------
# Kernels
# ---------------------------------------------------------------------------

def _freblock_kernel_stacked(re_ref, im_ref,
                             w1s_ref, b1s_ref,
                             wm2_ref, bm2_ref, wp2_ref, bp2_ref,
                             ore_ref, oim_ref, *, hidden):
    re = re_ref[...]                      # (C, T), T lanes dense
    im = im_ref[...]
    c = re.shape[0]

    mag = jnp.sqrt(re * re + im * im)     # torch.abs(x)
    pha = _atan2(im, re)                  # torch.angle(x)

    # Fused conv1: both 1x1 convs accumulate into one (2*hidden, T) tensor via
    # block-diagonal stacked weight columns (zero halves cost nothing extra in
    # vreg terms at C <= 8), so GELU runs once at full sublane occupancy.
    acc = b1s_ref[...] + w1s_ref[0] * mag[0:1, :]
    for i in range(1, c):
        acc = acc + w1s_ref[i] * mag[i:i + 1, :]
    for i in range(c):
        acc = acc + w1s_ref[c + i] * pha[i:i + 1, :]
    h = _gelu_exact(acc)                  # (2*hidden, T)

    # conv2 per path, reading sublane rows of the stacked hidden.
    mag2 = bm2_ref[...] + wm2_ref[0] * h[0:1, :]
    for j in range(1, hidden):
        mag2 = mag2 + wm2_ref[j] * h[j:j + 1, :]
    pha2 = bp2_ref[...] + wp2_ref[0] * h[hidden:hidden + 1, :]
    for j in range(1, hidden):
        pha2 = pha2 + wp2_ref[j] * h[hidden + j:hidden + j + 1, :]

    cosv, sinv = _sincos(pha2)            # shared range reduction
    ore_ref[...] = mag2 * cosv
    oim_ref[...] = mag2 * sinv


def _freblock_kernel_split(re_ref, im_ref,
                           wm1_ref, bm1_ref, wm2_ref, bm2_ref,
                           wp1_ref, bp1_ref, wp2_ref, bp2_ref,
                           ore_ref, oim_ref):
    # Fallback for wide channel counts (2*hidden > 8): hidden vregs are already
    # full, so stacking the paths would only double conv1 vreg work.
    re = re_ref[...]
    im = im_ref[...]
    mag = jnp.sqrt(re * re + im * im)
    pha = _atan2(im, re)
    hm = _gelu_exact(_conv1x1(mag, wm1_ref, bm1_ref))
    mag2 = _conv1x1(hm, wm2_ref, bm2_ref)
    hp = _gelu_exact(_conv1x1(pha, wp1_ref, bp1_ref))
    pha2 = _conv1x1(hp, wp2_ref, bp2_ref)
    cosv, sinv = _sincos(pha2)
    ore_ref[...] = mag2 * cosv
    oim_ref[...] = mag2 * sinv


# ---------------------------------------------------------------------------
# Host wrappers
# ---------------------------------------------------------------------------

def _round_up(v, m):
    return ((v + m - 1) // m) * m


def _pick_tile_px(hw_pad, max_px, want_two_steps):
    """Largest pixel tile that is a multiple of 128, divides hw_pad, <= max_px."""
    limit = min(max_px, hw_pad)
    if want_two_steps and hw_pad >= 256:
        limit = min(limit, hw_pad // 2)    # keep n_px >= 2 for v7x's 2 TCs
    t = max(128, limit - (limit % 128))
    while hw_pad % t != 0:
        t -= 128
    return t


def freblock_pallas_planar(re, im, params, *, max_block_px=16384):
    """FreBlock forward on planar f32 re/im planes of shape (N, C, ...)."""
    wm1, bm1, wm2, bm2, wp1, bp1, wp2, bp2 = params
    N, C = re.shape[0], re.shape[1]
    HW = int(np.prod(re.shape[2:]))

    re2 = jnp.asarray(re, jnp.float32).reshape(N, C, HW)
    im2 = jnp.asarray(im, jnp.float32).reshape(N, C, HW)

    # Pad ragged spatial extents up to a lane multiple so every store stays an
    # unmasked full-lane vst and the pixel grid stays pipelined.
    HW_pad = _round_up(HW, 128)
    if HW_pad != HW:
        pad = ((0, 0), (0, 0), (0, HW_pad - HW))
        re2 = jnp.pad(re2, pad)
        im2 = jnp.pad(im2, pad)

    T = _pick_tile_px(HW_pad, max_block_px, want_two_steps=(N == 1))
    n_px = HW_pad // T

    ch = C // 2
    hst = 2 * ch
    stack = hst <= 8   # stacking is free only while the stacked hidden fits
                       # one sublane group

    def wcol(w):  # (Cout, Cin) -> (Cin, Cout, 1)
        return jnp.transpose(jnp.asarray(w, jnp.float32)).reshape(w.shape[1], w.shape[0], 1)

    def bcol(b):
        return jnp.asarray(b, jnp.float32).reshape(-1, 1)

    if stack:
        # Block-diagonal stacked conv1 columns: rows [0,ch) = mag path,
        # rows [ch, 2*ch) = pha path.
        w1s = jnp.zeros((2 * C, hst, 1), jnp.float32)
        w1s = w1s.at[:C, :ch, 0].set(jnp.transpose(jnp.asarray(wm1, jnp.float32)))
        w1s = w1s.at[C:, ch:, 0].set(jnp.transpose(jnp.asarray(wp1, jnp.float32)))
        b1s = jnp.concatenate([jnp.asarray(bm1, jnp.float32),
                               jnp.asarray(bp1, jnp.float32)]).reshape(-1, 1)
        consts = (w1s, b1s, wcol(wm2), bcol(bm2), wcol(wp2), bcol(bp2))
        kernel = partial(_freblock_kernel_stacked, hidden=ch)
    else:
        consts = (wcol(wm1), bcol(bm1), wcol(wm2), bcol(bm2),
                  wcol(wp1), bcol(bp1), wcol(wp2), bcol(bp2))
        kernel = _freblock_kernel_split

    px_spec = pl.BlockSpec((None, C, T), lambda n, p: (n, 0, p))

    def const_spec(a):
        return pl.BlockSpec(a.shape, lambda n, p: (0,) * a.ndim)

    # 4 pixel planes (2 in + 2 out) x 2 pipeline buffers
    # + in-kernel materialized intermediates (mag, pha, stacked hidden, trig
    #   temps, spill) ~ 10 planes, + weights/headroom.
    plane = C * T * 4
    vmem_bytes = 4 * 2 * plane + 10 * plane + (2 << 20)
    vmem_bytes = int(min(max(vmem_bytes, 8 << 20), 56 << 20))

    out_re, out_im = pl.pallas_call(
        kernel,
        out_shape=(jax.ShapeDtypeStruct((N, C, HW_pad), jnp.float32),
                   jax.ShapeDtypeStruct((N, C, HW_pad), jnp.float32)),
        grid_spec=pltpu.PrefetchScalarGridSpec(
            num_scalar_prefetch=0,
            grid=(N, n_px),
            in_specs=[px_spec, px_spec] + [const_spec(a) for a in consts],
            out_specs=(px_spec, px_spec)),
        compiler_params=pltpu.CompilerParams(
            dimension_semantics=("parallel", "parallel"),
            vmem_limit_bytes=vmem_bytes),
    )(re2, im2, *consts)

    if HW_pad != HW:
        out_re = out_re[:, :, :HW]
        out_im = out_im[:, :, :HW]
    return out_re, out_im


def freblock_pallas(x, params, *, max_block_px=16384):
    """FreBlock forward.  x: complex64 NCHW.

    params (PyTorch layouts):
      wm1 = processmag[0].weight[:, :, 0, 0]  (C/2, C),   bm1 (C/2,)
      wm2 = processmag[2].weight[:, :, 0, 0]  (C, C/2),   bm2 (C,)
      wp1, bp1, wp2, bp2: same four for processpha.
    """
    N, C, H, W = x.shape
    # TODO(synk): jnp.real/imag + lax.complex are extra HBM passes that XLA
    # cannot fuse into the pallas_call; callers that hold planar f32 re/im
    # planes (e.g. around a planar FFT) should use freblock_pallas_planar
    # directly.  De-interleaving the raw complex64 buffer inside the kernel
    # needs a stride-2 lane unzip with no cheap Mosaic primitive, so it is not
    # attempted here.
    re = jnp.real(x)
    im = jnp.imag(x)
    out_re, out_im = freblock_pallas_planar(re, im, params,
                                            max_block_px=max_block_px)
    out = jax.lax.complex(out_re, out_im)
    return out.reshape(N, C, H, W)


def freblock_ref(x, params):
    """Pure-JAX reference with identical semantics (for verification)."""
    wm1, bm1, wm2, bm2, wp1, bp1, wp2, bp2 = params
    mag = jnp.abs(x)
    pha = jnp.angle(x)
    hi = jax.lax.Precision.HIGHEST

    def mlp(v, w1, b1, w2, b2):
        h = jnp.einsum('nihw,oi->nohw', v, w1, precision=hi) + b1[None, :, None, None]
        h = jax.nn.gelu(h, approximate=False)
        return jnp.einsum('nihw,oi->nohw', h, w2, precision=hi) + b2[None, :, None, None]

    mag = mlp(mag, wm1, bm1, wm2, bm2)
    pha = mlp(pha, wp1, bp1, wp2, bp2)
    return jax.lax.complex(mag * jnp.cos(pha), mag * jnp.sin(pha))


if __name__ == "__main__":
    nc = 8
    N, H, W = 2, 16, 16

    key = jax.random.PRNGKey(0)
    k = jax.random.split(key, 10)

    # Complex input (FreBlock is applied to an FFT of a feature map).
    xr = jax.random.normal(k[0], (N, nc, H, W), jnp.float32)
    xi = jax.random.normal(k[1], (N, nc, H, W), jnp.float32)
    x = jax.lax.complex(xr, xi)

    ch = nc // 2
    s = 0.3
    params = (
        s * jax.random.normal(k[2], (ch, nc), jnp.float32),   # processmag[0].weight
        s * jax.random.normal(k[3], (ch,), jnp.float32),      # processmag[0].bias
        s * jax.random.normal(k[4], (nc, ch), jnp.float32),   # processmag[2].weight
        s * jax.random.normal(k[5], (nc,), jnp.float32),      # processmag[2].bias
        s * jax.random.normal(k[6], (ch, nc), jnp.float32),   # processpha[0].weight
        s * jax.random.normal(k[7], (ch,), jnp.float32),      # processpha[0].bias
        s * jax.random.normal(k[8], (nc, ch), jnp.float32),   # processpha[2].weight
        s * jax.random.normal(k[9], (nc,), jnp.float32),      # processpha[2].bias
    )

    out = jax.block_until_ready(freblock_pallas(x, params))

    ref = freblock_ref(x, params)
    np.testing.assert_allclose(np.asarray(out), np.asarray(ref),
                               rtol=2e-3, atol=2e-3)
    print("KERNEL_OK")
</pallas_src>

<mosaic_0001>
module attributes {stable_mosaic.version = 11 : i64} {
  func.func @_freblock_kernel_stacked(%arg0: i32, %arg1: i32, %arg2: memref<1x8x256xf32, #tpu.memory_space<vmem>>, %arg3: memref<1x8x256xf32, #tpu.memory_space<vmem>>, %arg4: memref<16x8x1xf32, #tpu.memory_space<vmem>>, %arg5: memref<8x1xf32, #tpu.memory_space<vmem>>, %arg6: memref<4x8x1xf32, #tpu.memory_space<vmem>>, %arg7: memref<8x1xf32, #tpu.memory_space<vmem>>, %arg8: memref<4x8x1xf32, #tpu.memory_space<vmem>>, %arg9: memref<8x1xf32, #tpu.memory_space<vmem>>, %arg10: memref<1x8x256xf32, #tpu.memory_space<vmem>>, %arg11: memref<1x8x256xf32, #tpu.memory_space<vmem>>) attributes {dimension_semantics = [#tpu.dimension_semantics<parallel>, #tpu.dimension_semantics<parallel>], iteration_bounds = array<i64: 2, 1>, scalar_prefetch = 0 : i64, scratch_operands = 0 : i64, tpu.core_type = #tpu.core_type<tc>, window_params = [{transform_indices = @transform_0, window_bounds = array<i64: 1, 8, 256>}, {transform_indices = @transform_1, window_bounds = array<i64: 1, 8, 256>}, {pipeline_mode = #tpu.pipeline_mode<synchronous>, transform_indices = @transform_2, window_bounds = array<i64: 16, 8, 1>}, {pipeline_mode = #tpu.pipeline_mode<synchronous>, transform_indices = @transform_3, window_bounds = array<i64: 8, 1>}, {pipeline_mode = #tpu.pipeline_mode<synchronous>, transform_indices = @transform_4, window_bounds = array<i64: 4, 8, 1>}, {pipeline_mode = #tpu.pipeline_mode<synchronous>, transform_indices = @transform_5, window_bounds = array<i64: 8, 1>}, {pipeline_mode = #tpu.pipeline_mode<synchronous>, transform_indices = @transform_6, window_bounds = array<i64: 4, 8, 1>}, {pipeline_mode = #tpu.pipeline_mode<synchronous>, transform_indices = @transform_7, window_bounds = array<i64: 8, 1>}, {transform_indices = @transform_8, window_bounds = array<i64: 1, 8, 256>}, {transform_indices = @transform_9, window_bounds = array<i64: 1, 8, 256>}]} {
    %c0 = arith.constant 0 : index
    %c0_0 = arith.constant 0 : index
    %c0_1 = arith.constant 0 : index
    %0 = vector.load %arg2[%c0, %c0_0, %c0_1] : memref<1x8x256xf32, #tpu.memory_space<vmem>>, vector<1x8x256xf32>
    %1 = vector.shape_cast %0 : vector<1x8x256xf32> to vector<8x256xf32>
    %c0_2 = arith.constant 0 : index
    %c0_3 = arith.constant 0 : index
    %c0_4 = arith.constant 0 : index
    %2 = vector.load %arg3[%c0_2, %c0_3, %c0_4] : memref<1x8x256xf32, #tpu.memory_space<vmem>>, vector<1x8x256xf32>
    %3 = vector.shape_cast %2 : vector<1x8x256xf32> to vector<8x256xf32>
    %4 = arith.mulf %1, %1 : vector<8x256xf32>
    %5 = arith.mulf %3, %3 : vector<8x256xf32>
    %6 = arith.addf %4, %5 : vector<8x256xf32>
    %7 = math.sqrt %6 : vector<8x256xf32>
    %8 = math.absf %1 : vector<8x256xf32>
    %9 = math.absf %3 : vector<8x256xf32>
    %10 = arith.minimumf %8, %9 : vector<8x256xf32>
    %11 = arith.maximumf %8, %9 : vector<8x256xf32>
    %cst = arith.constant 1.000000e-30 : f32
    %12 = vector.broadcast %cst : f32 to vector<8x256xf32>
    %13 = arith.maximumf %11, %12 : vector<8x256xf32>
    %14 = tpu.reciprocal %13 {approx = true} : vector<8x256xf32> -> vector<8x256xf32>
    %15 = arith.mulf %13, %14 : vector<8x256xf32>
    %cst_5 = arith.constant 2.000000e+00 : f32
    %16 = vector.broadcast %cst_5 : f32 to vector<8x256xf32>
    %17 = arith.subf %16, %15 : vector<8x256xf32>
    %18 = arith.mulf %14, %17 : vector<8x256xf32>
    %19 = arith.mulf %10, %18 : vector<8x256xf32>
    %20 = arith.subf %10, %11 : vector<8x256xf32>
    %21 = arith.addf %10, %11 : vector<8x256xf32>
    %cst_6 = arith.constant 1.000000e-30 : f32
    %22 = vector.broadcast %cst_6 : f32 to vector<8x256xf32>
    %23 = arith.maximumf %21, %22 : vector<8x256xf32>
    %24 = tpu.reciprocal %23 {approx = true} : vector<8x256xf32> -> vector<8x256xf32>
    %25 = arith.mulf %23, %24 : vector<8x256xf32>
    %cst_7 = arith.constant 2.000000e+00 : f32
    %26 = vector.broadcast %cst_7 : f32 to vector<8x256xf32>
    %27 = arith.subf %26, %25 : vector<8x256xf32>
    %28 = arith.mulf %24, %27 : vector<8x256xf32>
    %29 = arith.mulf %20, %28 : vector<8x256xf32>
    %cst_8 = arith.constant 0.414213568 : f32
    %30 = vector.broadcast %cst_8 : f32 to vector<8x256xf32>
    %31 = arith.cmpf ogt, %19, %30 : vector<8x256xf32>
    %32 = arith.select %31, %29, %19 : vector<8x256xi1>, vector<8x256xf32>
    %33 = arith.mulf %32, %32 : vector<8x256xf32>
    %cst_9 = arith.constant 0.0805374458 : f32
    %34 = vector.broadcast %cst_9 : f32 to vector<8x256xf32>
    %35 = arith.mulf %34, %33 : vector<8x256xf32>
    %cst_10 = arith.constant 0.138776854 : f32
    %36 = vector.broadcast %cst_10 : f32 to vector<8x256xf32>
    %37 = arith.subf %35, %36 : vector<8x256xf32>
    %38 = arith.mulf %37, %33 : vector<8x256xf32>
    %cst_11 = arith.constant 0.199777111 : f32
    %39 = vector.broadcast %cst_11 : f32 to vector<8x256xf32>
    %40 = arith.addf %38, %39 : vector<8x256xf32>
    %41 = arith.mulf %40, %33 : vector<8x256xf32>
    %cst_12 = arith.constant 0.333329499 : f32
    %42 = vector.broadcast %cst_12 : f32 to vector<8x256xf32>
    %43 = arith.subf %41, %42 : vector<8x256xf32>
    %44 = arith.mulf %43, %33 : vector<8x256xf32>
    %45 = arith.mulf %44, %32 : vector<8x256xf32>
    %46 = arith.addf %45, %32 : vector<8x256xf32>
    %cst_13 = arith.constant 0.785398185 : f32
    %47 = vector.broadcast %cst_13 : f32 to vector<8x256xf32>
    %48 = arith.addf %46, %47 : vector<8x256xf32>
    %49 = arith.select %31, %48, %46 : vector<8x256xi1>, vector<8x256xf32>
    %50 = arith.cmpf ogt, %9, %8 : vector<8x256xf32>
    %cst_14 = arith.constant 1.57079637 : f32
    %51 = vector.broadcast %cst_14 : f32 to vector<8x256xf32>
    %52 = arith.subf %51, %49 : vector<8x256xf32>
    %53 = arith.select %50, %52, %49 : vector<8x256xi1>, vector<8x256xf32>
    %cst_15 = arith.constant 0.000000e+00 : f32
    %54 = vector.broadcast %cst_15 : f32 to vector<8x256xf32>
    %55 = arith.cmpf olt, %1, %54 : vector<8x256xf32>
    %cst_16 = arith.constant 3.14159274 : f32
    %56 = vector.broadcast %cst_16 : f32 to vector<8x256xf32>
    %57 = arith.subf %56, %53 : vector<8x256xf32>
    %58 = arith.select %55, %57, %53 : vector<8x256xi1>, vector<8x256xf32>
    %cst_17 = arith.constant 0.000000e+00 : f32
    %59 = vector.broadcast %cst_17 : f32 to vector<8x256xf32>
    %60 = arith.cmpf olt, %3, %59 : vector<8x256xf32>
    %cst_18 = arith.constant 0.000000e+00 : f32
    %61 = vector.broadcast %cst_18 : f32 to vector<8x256xf32>
    %62 = arith.subf %61, %58 : vector<8x256xf32>
    %63 = arith.select %60, %62, %58 : vector<8x256xi1>, vector<8x256xf32>
    %c0_19 = arith.constant 0 : index
    %c0_20 = arith.constant 0 : index
    %64 = vector.load %arg5[%c0_19, %c0_20] : memref<8x1xf32, #tpu.memory_space<vmem>>, vector<8x1xf32>
    %c0_21 = arith.constant 0 : index
    %c0_22 = arith.constant 0 : index
    %c0_23 = arith.constant 0 : index
    %65 = vector.load %arg4[%c0_21, %c0_22, %c0_23] : memref<16x8x1xf32, #tpu.memory_space<vmem>>, vector<1x8x1xf32>
    %66 = vector.shape_cast %65 : vector<1x8x1xf32> to vector<8x1xf32>
    %67 = vector.extract_strided_slice %7 {offsets = [0, 0], sizes = [1, 256], strides = [1, 1]} : vector<8x256xf32> to vector<1x256xf32>
    %68 = vector.broadcast %66 : vector<8x1xf32> to vector<8x256xf32>
    %69 = vector.broadcast %67 : vector<1x256xf32> to vector<8x256xf32>
    %70 = arith.mulf %68, %69 : vector<8x256xf32>
    %71 = vector.broadcast %64 : vector<8x1xf32> to vector<8x256xf32>
    %72 = arith.addf %71, %70 : vector<8x256xf32>
    %c1 = arith.constant 1 : index
    %c0_24 = arith.constant 0 : index
    %c0_25 = arith.constant 0 : index
    %73 = vector.load %arg4[%c1, %c0_24, %c0_25] : memref<16x8x1xf32, #tpu.memory_space<vmem>>, vector<1x8x1xf32>
    %74 = vector.shape_cast %73 : vector<1x8x1xf32> to vector<8x1xf32>
    %75 = vector.extract_strided_slice %7 {offsets = [1, 0], sizes = [1, 256], strides = [1, 1]} : vector<8x256xf32> to vector<1x256xf32>
    %76 = vector.broadcast %74 : vector<8x1xf32> to vector<8x256xf32>
    %77 = vector.broadcast %75 : vector<1x256xf32> to vector<8x256xf32>
    %78 = arith.mulf %76, %77 : vector<8x256xf32>
    %79 = arith.addf %72, %78 : vector<8x256xf32>
    %c2 = arith.constant 2 : index
    %c0_26 = arith.constant 0 : index
    %c0_27 = arith.constant 0 : index
    %80 = vector.load %arg4[%c2, %c0_26, %c0_27] : memref<16x8x1xf32, #tpu.memory_space<vmem>>, vector<1x8x1xf32>
    %81 = vector.shape_cast %80 : vector<1x8x1xf32> to vector<8x1xf32>
    %82 = vector.extract_strided_slice %7 {offsets = [2, 0], sizes = [1, 256], strides = [1, 1]} : vector<8x256xf32> to vector<1x256xf32>
    %83 = vector.broadcast %81 : vector<8x1xf32> to vector<8x256xf32>
    %84 = vector.broadcast %82 : vector<1x256xf32> to vector<8x256xf32>
    %85 = arith.mulf %83, %84 : vector<8x256xf32>
    %86 = arith.addf %79, %85 : vector<8x256xf32>
    %c3 = arith.constant 3 : index
    %c0_28 = arith.constant 0 : index
    %c0_29 = arith.constant 0 : index
    %87 = vector.load %arg4[%c3, %c0_28, %c0_29] : memref<16x8x1xf32, #tpu.memory_space<vmem>>, vector<1x8x1xf32>
    %88 = vector.shape_cast %87 : vector<1x8x1xf32> to vector<8x1xf32>
    %89 = vector.extract_strided_slice %7 {offsets = [3, 0], sizes = [1, 256], strides = [1, 1]} : vector<8x256xf32> to vector<1x256xf32>
    %90 = vector.broadcast %88 : vector<8x1xf32> to vector<8x256xf32>
    %91 = vector.broadcast %89 : vector<1x256xf32> to vector<8x256xf32>
    %92 = arith.mulf %90, %91 : vector<8x256xf32>
    %93 = arith.addf %86, %92 : vector<8x256xf32>
    %c4 = arith.constant 4 : index
    %c0_30 = arith.constant 0 : index
    %c0_31 = arith.constant 0 : index
    %94 = vector.load %arg4[%c4, %c0_30, %c0_31] : memref<16x8x1xf32, #tpu.memory_space<vmem>>, vector<1x8x1xf32>
    %95 = vector.shape_cast %94 : vector<1x8x1xf32> to vector<8x1xf32>
    %96 = vector.extract_strided_slice %7 {offsets = [4, 0], sizes = [1, 256], strides = [1, 1]} : vector<8x256xf32> to vector<1x256xf32>
    %97 = vector.broadcast %95 : vector<8x1xf32> to vector<8x256xf32>
    %98 = vector.broadcast %96 : vector<1x256xf32> to vector<8x256xf32>
    %99 = arith.mulf %97, %98 : vector<8x256xf32>
    %100 = arith.addf %93, %99 : vector<8x256xf32>
    %c5 = arith.constant 5 : index
    %c0_32 = arith.constant 0 : index
    %c0_33 = arith.constant 0 : index
    %101 = vector.load %arg4[%c5, %c0_32, %c0_33] : memref<16x8x1xf32, #tpu.memory_space<vmem>>, vector<1x8x1xf32>
    %102 = vector.shape_cast %101 : vector<1x8x1xf32> to vector<8x1xf32>
    %103 = vector.extract_strided_slice %7 {offsets = [5, 0], sizes = [1, 256], strides = [1, 1]} : vector<8x256xf32> to vector<1x256xf32>
    %104 = vector.broadcast %102 : vector<8x1xf32> to vector<8x256xf32>
    %105 = vector.broadcast %103 : vector<1x256xf32> to vector<8x256xf32>
    %106 = arith.mulf %104, %105 : vector<8x256xf32>
    %107 = arith.addf %100, %106 : vector<8x256xf32>
    %c6 = arith.constant 6 : index
    %c0_34 = arith.constant 0 : index
    %c0_35 = arith.constant 0 : index
    %108 = vector.load %arg4[%c6, %c0_34, %c0_35] : memref<16x8x1xf32, #tpu.memory_space<vmem>>, vector<1x8x1xf32>
    %109 = vector.shape_cast %108 : vector<1x8x1xf32> to vector<8x1xf32>
    %110 = vector.extract_strided_slice %7 {offsets = [6, 0], sizes = [1, 256], strides = [1, 1]} : vector<8x256xf32> to vector<1x256xf32>
    %111 = vector.broadcast %109 : vector<8x1xf32> to vector<8x256xf32>
    %112 = vector.broadcast %110 : vector<1x256xf32> to vector<8x256xf32>
    %113 = arith.mulf %111, %112 : vector<8x256xf32>
    %114 = arith.addf %107, %113 : vector<8x256xf32>
    %c7 = arith.constant 7 : index
    %c0_36 = arith.constant 0 : index
    %c0_37 = arith.constant 0 : index
    %115 = vector.load %arg4[%c7, %c0_36, %c0_37] : memref<16x8x1xf32, #tpu.memory_space<vmem>>, vector<1x8x1xf32>
    %116 = vector.shape_cast %115 : vector<1x8x1xf32> to vector<8x1xf32>
    %117 = vector.extract_strided_slice %7 {offsets = [7, 0], sizes = [1, 256], strides = [1, 1]} : vector<8x256xf32> to vector<1x256xf32>
    %118 = vector.broadcast %116 : vector<8x1xf32> to vector<8x256xf32>
    %119 = vector.broadcast %117 : vector<1x256xf32> to vector<8x256xf32>
    %120 = arith.mulf %118, %119 : vector<8x256xf32>
    %121 = arith.addf %114, %120 : vector<8x256xf32>
    %c8 = arith.constant 8 : index
    %c0_38 = arith.constant 0 : index
    %c0_39 = arith.constant 0 : index
    %122 = vector.load %arg4[%c8, %c0_38, %c0_39] : memref<16x8x1xf32, #tpu.memory_space<vmem>>, vector<1x8x1xf32>
    %123 = vector.shape_cast %122 : vector<1x8x1xf32> to vector<8x1xf32>
    %124 = vector.extract_strided_slice %63 {offsets = [0, 0], sizes = [1, 256], strides = [1, 1]} : vector<8x256xf32> to vector<1x256xf32>
    %125 = vector.broadcast %123 : vector<8x1xf32> to vector<8x256xf32>
    %126 = vector.broadcast %124 : vector<1x256xf32> to vector<8x256xf32>
    %127 = arith.mulf %125, %126 : vector<8x256xf32>
    %128 = arith.addf %121, %127 : vector<8x256xf32>
    %c9 = arith.constant 9 : index
    %c0_40 = arith.constant 0 : index
    %c0_41 = arith.constant 0 : index
    %129 = vector.load %arg4[%c9, %c0_40, %c0_41] : memref<16x8x1xf32, #tpu.memory_space<vmem>>, vector<1x8x1xf32>
    %130 = vector.shape_cast %129 : vector<1x8x1xf32> to vector<8x1xf32>
    %131 = vector.extract_strided_slice %63 {offsets = [1, 0], sizes = [1, 256], strides = [1, 1]} : vector<8x256xf32> to vector<1x256xf32>
    %132 = vector.broadcast %130 : vector<8x1xf32> to vector<8x256xf32>
    %133 = vector.broadcast %131 : vector<1x256xf32> to vector<8x256xf32>
    %134 = arith.mulf %132, %133 : vector<8x256xf32>
    %135 = arith.addf %128, %134 : vector<8x256xf32>
    %c10 = arith.constant 10 : index
    %c0_42 = arith.constant 0 : index
    %c0_43 = arith.constant 0 : index
    %136 = vector.load %arg4[%c10, %c0_42, %c0_43] : memref<16x8x1xf32, #tpu.memory_space<vmem>>, vector<1x8x1xf32>
    %137 = vector.shape_cast %136 : vector<1x8x1xf32> to vector<8x1xf32>
    %138 = vector.extract_strided_slice %63 {offsets = [2, 0], sizes = [1, 256], strides = [1, 1]} : vector<8x256xf32> to vector<1x256xf32>
    %139 = vector.broadcast %137 : vector<8x1xf32> to vector<8x256xf32>
    %140 = vector.broadcast %138 : vector<1x256xf32> to vector<8x256xf32>
    %141 = arith.mulf %139, %140 : vector<8x256xf32>
    %142 = arith.addf %135, %141 : vector<8x256xf32>
    %c11 = arith.constant 11 : index
    %c0_44 = arith.constant 0 : index
    %c0_45 = arith.constant 0 : index
    %143 = vector.load %arg4[%c11, %c0_44, %c0_45] : memref<16x8x1xf32, #tpu.memory_space<vmem>>, vector<1x8x1xf32>
    %144 = vector.shape_cast %143 : vector<1x8x1xf32> to vector<8x1xf32>
    %145 = vector.extract_strided_slice %63 {offsets = [3, 0], sizes = [1, 256], strides = [1, 1]} : vector<8x256xf32> to vector<1x256xf32>
    %146 = vector.broadcast %144 : vector<8x1xf32> to vector<8x256xf32>
    %147 = vector.broadcast %145 : vector<1x256xf32> to vector<8x256xf32>
    %148 = arith.mulf %146, %147 : vector<8x256xf32>
    %149 = arith.addf %142, %148 : vector<8x256xf32>
    %c12 = arith.constant 12 : index
    %c0_46 = arith.constant 0 : index
    %c0_47 = arith.constant 0 : index
    %150 = vector.load %arg4[%c12, %c0_46, %c0_47] : memref<16x8x1xf32, #tpu.memory_space<vmem>>, vector<1x8x1xf32>
    %151 = vector.shape_cast %150 : vector<1x8x1xf32> to vector<8x1xf32>
    %152 = vector.extract_strided_slice %63 {offsets = [4, 0], sizes = [1, 256], strides = [1, 1]} : vector<8x256xf32> to vector<1x256xf32>
    %153 = vector.broadcast %151 : vector<8x1xf32> to vector<8x256xf32>
    %154 = vector.broadcast %152 : vector<1x256xf32> to vector<8x256xf32>
    %155 = arith.mulf %153, %154 : vector<8x256xf32>
    %156 = arith.addf %149, %155 : vector<8x256xf32>
    %c13 = arith.constant 13 : index
    %c0_48 = arith.constant 0 : index
    %c0_49 = arith.constant 0 : index
    %157 = vector.load %arg4[%c13, %c0_48, %c0_49] : memref<16x8x1xf32, #tpu.memory_space<vmem>>, vector<1x8x1xf32>
    %158 = vector.shape_cast %157 : vector<1x8x1xf32> to vector<8x1xf32>
    %159 = vector.extract_strided_slice %63 {offsets = [5, 0], sizes = [1, 256], strides = [1, 1]} : vector<8x256xf32> to vector<1x256xf32>
    %160 = vector.broadcast %158 : vector<8x1xf32> to vector<8x256xf32>
    %161 = vector.broadcast %159 : vector<1x256xf32> to vector<8x256xf32>
    %162 = arith.mulf %160, %161 : vector<8x256xf32>
    %163 = arith.addf %156, %162 : vector<8x256xf32>
    %c14 = arith.constant 14 : index
    %c0_50 = arith.constant 0 : index
    %c0_51 = arith.constant 0 : index
    %164 = vector.load %arg4[%c14, %c0_50, %c0_51] : memref<16x8x1xf32, #tpu.memory_space<vmem>>, vector<1x8x1xf32>
    %165 = vector.shape_cast %164 : vector<1x8x1xf32> to vector<8x1xf32>
    %166 = vector.extract_strided_slice %63 {offsets = [6, 0], sizes = [1, 256], strides = [1, 1]} : vector<8x256xf32> to vector<1x256xf32>
    %167 = vector.broadcast %165 : vector<8x1xf32> to vector<8x256xf32>
    %168 = vector.broadcast %166 : vector<1x256xf32> to vector<8x256xf32>
    %169 = arith.mulf %167, %168 : vector<8x256xf32>
    %170 = arith.addf %163, %169 : vector<8x256xf32>
    %c15 = arith.constant 15 : index
    %c0_52 = arith.constant 0 : index
    %c0_53 = arith.constant 0 : index
    %171 = vector.load %arg4[%c15, %c0_52, %c0_53] : memref<16x8x1xf32, #tpu.memory_space<vmem>>, vector<1x8x1xf32>
    %172 = vector.shape_cast %171 : vector<1x8x1xf32> to vector<8x1xf32>
    %173 = vector.extract_strided_slice %63 {offsets = [7, 0], sizes = [1, 256], strides = [1, 1]} : vector<8x256xf32> to vector<1x256xf32>
    %174 = vector.broadcast %172 : vector<8x1xf32> to vector<8x256xf32>
    %175 = vector.broadcast %173 : vector<1x256xf32> to vector<8x256xf32>
    %176 = arith.mulf %174, %175 : vector<8x256xf32>
    %177 = arith.addf %170, %176 : vector<8x256xf32>
    %cst_54 = arith.constant 5.000000e-01 : f32
    %178 = vector.broadcast %cst_54 : f32 to vector<8x256xf32>
    %179 = arith.mulf %178, %177 : vector<8x256xf32>
    %cst_55 = arith.constant 0.707106769 : f32
    %180 = vector.broadcast %cst_55 : f32 to vector<8x256xf32>
    %181 = arith.mulf %177, %180 : vector<8x256xf32>
    %182 = math.absf %181 : vector<8x256xf32>
    %cst_56 = arith.constant 5.000000e-01 : f32
    %183 = vector.broadcast %cst_56 : f32 to vector<8x256xf32>
    %184 = arith.mulf %183, %182 : vector<8x256xf32>
    %cst_57 = arith.constant 1.000000e+00 : f32
    %185 = vector.broadcast %cst_57 : f32 to vector<8x256xf32>
    %186 = arith.addf %185, %184 : vector<8x256xf32>
    %187 = tpu.reciprocal %186 {approx = true} : vector<8x256xf32> -> vector<8x256xf32>
    %188 = arith.mulf %186, %187 : vector<8x256xf32>
    %cst_58 = arith.constant 2.000000e+00 : f32
    %189 = vector.broadcast %cst_58 : f32 to vector<8x256xf32>
    %190 = arith.subf %189, %188 : vector<8x256xf32>
    %191 = arith.mulf %187, %190 : vector<8x256xf32>
    %cst_59 = arith.constant 0.170872763 : f32
    %192 = vector.broadcast %cst_59 : f32 to vector<8x256xf32>
    %193 = arith.mulf %191, %192 : vector<8x256xf32>
    %cst_60 = arith.constant -0.822152256 : f32
    %194 = vector.broadcast %cst_60 : f32 to vector<8x256xf32>
    %195 = arith.addf %194, %193 : vector<8x256xf32>
    %196 = arith.mulf %191, %195 : vector<8x256xf32>
    %cst_61 = arith.constant 1.48851585 : f32
    %197 = vector.broadcast %cst_61 : f32 to vector<8x256xf32>
    %198 = arith.addf %197, %196 : vector<8x256xf32>
    %199 = arith.mulf %191, %198 : vector<8x256xf32>
    %cst_62 = arith.constant -1.13520396 : f32
    %200 = vector.broadcast %cst_62 : f32 to vector<8x256xf32>
    %201 = arith.addf %200, %199 : vector<8x256xf32>
    %202 = arith.mulf %191, %201 : vector<8x256xf32>
    %cst_63 = arith.constant 0.278868079 : f32
    %203 = vector.broadcast %cst_63 : f32 to vector<8x256xf32>
    %204 = arith.addf %203, %202 : vector<8x256xf32>
    %205 = arith.mulf %191, %204 : vector<8x256xf32>
    %cst_64 = arith.constant -0.186288059 : f32
    %206 = vector.broadcast %cst_64 : f32 to vector<8x256xf32>
    %207 = arith.addf %206, %205 : vector<8x256xf32>
    %208 = arith.mulf %191, %207 : vector<8x256xf32>
    %cst_65 = arith.constant 0.0967841818 : f32
    %209 = vector.broadcast %cst_65 : f32 to vector<8x256xf32>
    %210 = arith.addf %209, %208 : vector<8x256xf32>
    %211 = arith.mulf %191, %210 : vector<8x256xf32>
    %cst_66 = arith.constant 0.374091953 : f32
    %212 = vector.broadcast %cst_66 : f32 to vector<8x256xf32>
    %213 = arith.addf %212, %211 : vector<8x256xf32>
    %214 = arith.mulf %191, %213 : vector<8x256xf32>
    %cst_67 = arith.constant 1.00002372 : f32
    %215 = vector.broadcast %cst_67 : f32 to vector<8x256xf32>
    %216 = arith.addf %215, %214 : vector<8x256xf32>
    %217 = arith.mulf %191, %216 : vector<8x256xf32>
    %cst_68 = arith.constant -1.26551223 : f32
    %218 = vector.broadcast %cst_68 : f32 to vector<8x256xf32>
    %219 = arith.addf %218, %217 : vector<8x256xf32>
    %cst_69 = arith.constant 0.000000e+00 : f32
    %220 = vector.broadcast %cst_69 : f32 to vector<8x256xf32>
    %221 = arith.subf %220, %182 : vector<8x256xf32>
    %222 = arith.mulf %221, %182 : vector<8x256xf32>
    %223 = arith.addf %222, %219 : vector<8x256xf32>
    %224 = math.exp %223 : vector<8x256xf32>
    %225 = arith.mulf %191, %224 : vector<8x256xf32>
    %cst_70 = arith.constant 0.000000e+00 : f32
    %226 = vector.broadcast %cst_70 : f32 to vector<8x256xf32>
    %227 = arith.cmpf oge, %181, %226 : vector<8x256xf32>
    %cst_71 = arith.constant 1.000000e+00 : f32
    %228 = vector.broadcast %cst_71 : f32 to vector<8x256xf32>
    %229 = arith.subf %228, %225 : vector<8x256xf32>
    %cst_72 = arith.constant 1.000000e+00 : f32
    %230 = vector.broadcast %cst_72 : f32 to vector<8x256xf32>
    %231 = arith.subf %225, %230 : vector<8x256xf32>
    %232 = arith.select %227, %229, %231 : vector<8x256xi1>, vector<8x256xf32>
    %cst_73 = arith.constant 1.000000e+00 : f32
    %233 = vector.broadcast %cst_73 : f32 to vector<8x256xf32>
    %234 = arith.addf %233, %232 : vector<8x256xf32>
    %235 = arith.mulf %179, %234 : vector<8x256xf32>
    %c0_74 = arith.constant 0 : index
    %c0_75 = arith.constant 0 : index
    %236 = vector.load %arg7[%c0_74, %c0_75] : memref<8x1xf32, #tpu.memory_space<vmem>>, vector<8x1xf32>
    %c0_76 = arith.constant 0 : index
    %c0_77 = arith.constant 0 : index
    %c0_78 = arith.constant 0 : index
    %237 = vector.load %arg6[%c0_76, %c0_77, %c0_78] : memref<4x8x1xf32, #tpu.memory_space<vmem>>, vector<1x8x1xf32>
    %238 = vector.shape_cast %237 : vector<1x8x1xf32> to vector<8x1xf32>
    %239 = vector.extract_strided_slice %235 {offsets = [0, 0], sizes = [1, 256], strides = [1, 1]} : vector<8x256xf32> to vector<1x256xf32>
    %240 = vector.broadcast %238 : vector<8x1xf32> to vector<8x256xf32>
    %241 = vector.broadcast %239 : vector<1x256xf32> to vector<8x256xf32>
    %242 = arith.mulf %240, %241 : vector<8x256xf32>
    %243 = vector.broadcast %236 : vector<8x1xf32> to vector<8x256xf32>
    %244 = arith.addf %243, %242 : vector<8x256xf32>
    %c1_79 = arith.constant 1 : index
    %c0_80 = arith.constant 0 : index
    %c0_81 = arith.constant 0 : index
    %245 = vector.load %arg6[%c1_79, %c0_80, %c0_81] : memref<4x8x1xf32, #tpu.memory_space<vmem>>, vector<1x8x1xf32>
    %246 = vector.shape_cast %245 : vector<1x8x1xf32> to vector<8x1xf32>
    %247 = vector.extract_strided_slice %235 {offsets = [1, 0], sizes = [1, 256], strides = [1, 1]} : vector<8x256xf32> to vector<1x256xf32>
    %248 = vector.broadcast %246 : vector<8x1xf32> to vector<8x256xf32>
    %249 = vector.broadcast %247 : vector<1x256xf32> to vector<8x256xf32>
    %250 = arith.mulf %248, %249 : vector<8x256xf32>
    %251 = arith.addf %244, %250 : vector<8x256xf32>
    %c2_82 = arith.constant 2 : index
    %c0_83 = arith.constant 0 : index
    %c0_84 = arith.constant 0 : index
    %252 = vector.load %arg6[%c2_82, %c0_83, %c0_84] : memref<4x8x1xf32, #tpu.memory_space<vmem>>, vector<1x8x1xf32>
    %253 = vector.shape_cast %252 : vector<1x8x1xf32> to vector<8x1xf32>
    %254 = vector.extract_strided_slice %235 {offsets = [2, 0], sizes = [1, 256], strides = [1, 1]} : vector<8x256xf32> to vector<1x256xf32>
    %255 = vector.broadcast %253 : vector<8x1xf32> to vector<8x256xf32>
    %256 = vector.broadcast %254 : vector<1x256xf32> to vector<8x256xf32>
    %257 = arith.mulf %255, %256 : vector<8x256xf32>
    %258 = arith.addf %251, %257 : vector<8x256xf32>
    %c3_85 = arith.constant 3 : index
    %c0_86 = arith.constant 0 : index
    %c0_87 = arith.constant 0 : index
    %259 = vector.load %arg6[%c3_85, %c0_86, %c0_87] : memref<4x8x1xf32, #tpu.memory_space<vmem>>, vector<1x8x1xf32>
    %260 = vector.shape_cast %259 : vector<1x8x1xf32> to vector<8x1xf32>
    %261 = vector.extract_strided_slice %235 {offsets = [3, 0], sizes = [1, 256], strides = [1, 1]} : vector<8x256xf32> to vector<1x256xf32>
    %262 = vector.broadcast %260 : vector<8x1xf32> to vector<8x256xf32>
    %263 = vector.broadcast %261 : vector<1x256xf32> to vector<8x256xf32>
    %264 = arith.mulf %262, %263 : vector<8x256xf32>
    %265 = arith.addf %258, %264 : vector<8x256xf32>
    %c0_88 = arith.constant 0 : index
    %c0_89 = arith.constant 0 : index
    %266 = vector.load %arg9[%c0_88, %c0_89] : memref<8x1xf32, #tpu.memory_space<vmem>>, vector<8x1xf32>
    %c0_90 = arith.constant 0 : index
    %c0_91 = arith.constant 0 : index
    %c0_92 = arith.constant 0 : index
    %267 = vector.load %arg8[%c0_90, %c0_91, %c0_92] : memref<4x8x1xf32, #tpu.memory_space<vmem>>, vector<1x8x1xf32>
    %268 = vector.shape_cast %267 : vector<1x8x1xf32> to vector<8x1xf32>
    %269 = vector.extract_strided_slice %235 {offsets = [4, 0], sizes = [1, 256], strides = [1, 1]} : vector<8x256xf32> to vector<1x256xf32>
    %270 = vector.broadcast %268 : vector<8x1xf32> to vector<8x256xf32>
    %271 = vector.broadcast %269 : vector<1x256xf32> to vector<8x256xf32>
    %272 = arith.mulf %270, %271 : vector<8x256xf32>
    %273 = vector.broadcast %266 : vector<8x1xf32> to vector<8x256xf32>
    %274 = arith.addf %273, %272 : vector<8x256xf32>
    %c1_93 = arith.constant 1 : index
    %c0_94 = arith.constant 0 : index
    %c0_95 = arith.constant 0 : index
    %275 = vector.load %arg8[%c1_93, %c0_94, %c0_95] : memref<4x8x1xf32, #tpu.memory_space<vmem>>, vector<1x8x1xf32>
    %276 = vector.shape_cast %275 : vector<1x8x1xf32> to vector<8x1xf32>
    %277 = vector.extract_strided_slice %235 {offsets = [5, 0], sizes = [1, 256], strides = [1, 1]} : vector<8x256xf32> to vector<1x256xf32>
    %278 = vector.broadcast %276 : vector<8x1xf32> to vector<8x256xf32>
    %279 = vector.broadcast %277 : vector<1x256xf32> to vector<8x256xf32>
    %280 = arith.mulf %278, %279 : vector<8x256xf32>
    %281 = arith.addf %274, %280 : vector<8x256xf32>
    %c2_96 = arith.constant 2 : index
    %c0_97 = arith.constant 0 : index
    %c0_98 = arith.constant 0 : index
    %282 = vector.load %arg8[%c2_96, %c0_97, %c0_98] : memref<4x8x1xf32, #tpu.memory_space<vmem>>, vector<1x8x1xf32>
    %283 = vector.shape_cast %282 : vector<1x8x1xf32> to vector<8x1xf32>
    %284 = vector.extract_strided_slice %235 {offsets = [6, 0], sizes = [1, 256], strides = [1, 1]} : vector<8x256xf32> to vector<1x256xf32>
    %285 = vector.broadcast %283 : vector<8x1xf32> to vector<8x256xf32>
    %286 = vector.broadcast %284 : vector<1x256xf32> to vector<8x256xf32>
    %287 = arith.mulf %285, %286 : vector<8x256xf32>
    %288 = arith.addf %281, %287 : vector<8x256xf32>
    %c3_99 = arith.constant 3 : index
    %c0_100 = arith.constant 0 : index
    %c0_101 = arith.constant 0 : index
    %289 = vector.load %arg8[%c3_99, %c0_100, %c0_101] : memref<4x8x1xf32, #tpu.memory_space<vmem>>, vector<1x8x1xf32>
    %290 = vector.shape_cast %289 : vector<1x8x1xf32> to vector<8x1xf32>
    %291 = vector.extract_strided_slice %235 {offsets = [7, 0], sizes = [1, 256], strides = [1, 1]} : vector<8x256xf32> to vector<1x256xf32>
    %292 = vector.broadcast %290 : vector<8x1xf32> to vector<8x256xf32>
    %293 = vector.broadcast %291 : vector<1x256xf32> to vector<8x256xf32>
    %294 = arith.mulf %292, %293 : vector<8x256xf32>
    %295 = arith.addf %288, %294 : vector<8x256xf32>
    %cst_102 = arith.constant 0.636619746 : f32
    %296 = vector.broadcast %cst_102 : f32 to vector<8x256xf32>
    %297 = arith.mulf %295, %296 : vector<8x256xf32>
    %cst_103 = arith.constant 5.000000e-01 : f32
    %298 = vector.broadcast %cst_103 : f32 to vector<8x256xf32>
    %299 = arith.addf %297, %298 : vector<8x256xf32>
    %300 = math.floor %299 : vector<8x256xf32>
    %cst_104 = arith.constant 1.57079637 : f32
    %301 = vector.broadcast %cst_104 : f32 to vector<8x256xf32>
    %302 = arith.mulf %300, %301 : vector<8x256xf32>
    %303 = arith.subf %295, %302 : vector<8x256xf32>
    %cst_105 = arith.constant -4.37113883E-8 : f32
    %304 = vector.broadcast %cst_105 : f32 to vector<8x256xf32>
    %305 = arith.mulf %300, %304 : vector<8x256xf32>
    %306 = arith.subf %303, %305 : vector<8x256xf32>
    %307 = arith.mulf %306, %306 : vector<8x256xf32>
    %cst_106 = arith.constant -1.95152956E-4 : f32
    %308 = vector.broadcast %cst_106 : f32 to vector<8x256xf32>
    %309 = arith.mulf %308, %307 : vector<8x256xf32>
    %cst_107 = arith.constant 0.00833216123 : f32
    %310 = vector.broadcast %cst_107 : f32 to vector<8x256xf32>
    %311 = arith.addf %309, %310 : vector<8x256xf32>
    %312 = arith.mulf %311, %307 : vector<8x256xf32>
    %cst_108 = arith.constant 0.166666552 : f32
    %313 = vector.broadcast %cst_108 : f32 to vector<8x256xf32>
    %314 = arith.subf %312, %313 : vector<8x256xf32>
    %315 = arith.mulf %314, %307 : vector<8x256xf32>
    %316 = arith.mulf %315, %306 : vector<8x256xf32>
    %317 = arith.addf %316, %306 : vector<8x256xf32>
    %cst_109 = arith.constant 2.44331568E-5 : f32
    %318 = vector.broadcast %cst_109 : f32 to vector<8x256xf32>
    %319 = arith.mulf %318, %307 : vector<8x256xf32>
    %cst_110 = arith.constant 0.00138873165 : f32
    %320 = vector.broadcast %cst_110 : f32 to vector<8x256xf32>
    %321 = arith.subf %319, %320 : vector<8x256xf32>
    %322 = arith.mulf %321, %307 : vector<8x256xf32>
    %cst_111 = arith.constant 0.0416666456 : f32
    %323 = vector.broadcast %cst_111 : f32 to vector<8x256xf32>
    %324 = arith.addf %322, %323 : vector<8x256xf32>
    %325 = arith.mulf %324, %307 : vector<8x256xf32>
    %326 = arith.mulf %325, %307 : vector<8x256xf32>
    %cst_112 = arith.constant 5.000000e-01 : f32
    %327 = vector.broadcast %cst_112 : f32 to vector<8x256xf32>
    %328 = arith.mulf %327, %307 : vector<8x256xf32>
    %329 = arith.subf %326, %328 : vector<8x256xf32>
    %cst_113 = arith.constant 1.000000e+00 : f32
    %330 = vector.broadcast %cst_113 : f32 to vector<8x256xf32>
    %331 = arith.addf %329, %330 : vector<8x256xf32>
    %332 = arith.fptosi %300 : vector<8x256xf32> to vector<8x256xi32>
    %c1_i32 = arith.constant 1 : i32
    %333 = vector.broadcast %c1_i32 : i32 to vector<8x256xi32>
    %334 = arith.andi %332, %333 : vector<8x256xi32>
    %c1_i32_114 = arith.constant 1 : i32
    %335 = vector.broadcast %c1_i32_114 : i32 to vector<8x256xi32>
    %336 = arith.cmpi eq, %334, %335 : vector<8x256xi32>
    %c2_i32 = arith.constant 2 : i32
    %337 = vector.broadcast %c2_i32 : i32 to vector<8x256xi32>
    %338 = arith.andi %332, %337 : vector<8x256xi32>
    %c2_i32_115 = arith.constant 2 : i32
    %339 = vector.broadcast %c2_i32_115 : i32 to vector<8x256xi32>
    %340 = arith.cmpi eq, %338, %339 : vector<8x256xi32>
    %c1_i32_116 = arith.constant 1 : i32
    %341 = vector.broadcast %c1_i32_116 : i32 to vector<8x256xi32>
    %342 = arith.addi %332, %341 : vector<8x256xi32>
    %c2_i32_117 = arith.constant 2 : i32
    %343 = vector.broadcast %c2_i32_117 : i32 to vector<8x256xi32>
    %344 = arith.andi %342, %343 : vector<8x256xi32>
    %c2_i32_118 = arith.constant 2 : i32
    %345 = vector.broadcast %c2_i32_118 : i32 to vector<8x256xi32>
    %346 = arith.cmpi eq, %344, %345 : vector<8x256xi32>
    %347 = arith.select %336, %331, %317 : vector<8x256xi1>, vector<8x256xf32>
    %cst_119 = arith.constant 0.000000e+00 : f32
    %348 = vector.broadcast %cst_119 : f32 to vector<8x256xf32>
    %349 = arith.subf %348, %347 : vector<8x256xf32>
    %350 = arith.select %340, %349, %347 : vector<8x256xi1>, vector<8x256xf32>
    %351 = arith.select %336, %317, %331 : vector<8x256xi1>, vector<8x256xf32>
    %cst_120 = arith.constant 0.000000e+00 : f32
    %352 = vector.broadcast %cst_120 : f32 to vector<8x256xf32>
    %353 = arith.subf %352, %351 : vector<8x256xf32>
    %354 = arith.select %346, %353, %351 : vector<8x256xi1>, vector<8x256xf32>
    %355 = arith.mulf %265, %354 : vector<8x256xf32>
    %c0_121 = arith.constant 0 : index
    %c0_122 = arith.constant 0 : index
    %c0_123 = arith.constant 0 : index
    %356 = vector.load %arg10[%c0_121, %c0_122, %c0_123] : memref<1x8x256xf32, #tpu.memory_space<vmem>>, vector<1x8x256xf32>
    %357 = vector.shape_cast %356 : vector<1x8x256xf32> to vector<8x256xf32>
    %358 = vector.shape_cast %355 : vector<8x256xf32> to vector<1x8x256xf32>
    tpu.vector_store %arg10[%c0_121, %c0_122, %c0_123], %358 {strides = array<i32>} : memref<1x8x256xf32, #tpu.memory_space<vmem>>, vector<1x8x256xf32>,
    %359 = arith.mulf %265, %350 : vector<8x256xf32>
    %c0_124 = arith.constant 0 : index
    %c0_125 = arith.constant 0 : index
    %c0_126 = arith.constant 0 : index
    %360 = vector.load %arg11[%c0_124, %c0_125, %c0_126] : memref<1x8x256xf32, #tpu.memory_space<vmem>>, vector<1x8x256xf32>
    %361 = vector.shape_cast %360 : vector<1x8x256xf32> to vector<8x256xf32>
    %362 = vector.shape_cast %359 : vector<8x256xf32> to vector<1x8x256xf32>
    tpu.vector_store %arg11[%c0_124, %c0_125, %c0_126], %362 {strides = array<i32>} : memref<1x8x256xf32, #tpu.memory_space<vmem>>, vector<1x8x256xf32>,
    return
  }
  func.func @transform_0(%arg0: i32, %arg1: i32) -> (i32, i32, i32) {
    %c0_i32 = arith.constant 0 : i32
    %c0_i32_0 = arith.constant 0 : i32
    return %arg0, %c0_i32, %arg1 : i32, i32, i32
  }
  func.func @transform_1(%arg0: i32, %arg1: i32) -> (i32, i32, i32) {
    %c0_i32 = arith.constant 0 : i32
    %c0_i32_0 = arith.constant 0 : i32
    return %arg0, %c0_i32, %arg1 : i32, i32, i32
  }
  func.func @transform_2(%arg0: i32, %arg1: i32) -> (i32, i32, i32) {
    %c0_i32 = arith.constant 0 : i32
    %c0_i32_0 = arith.constant 0 : i32
    %c0_i32_1 = arith.constant 0 : i32
    %c0_i32_2 = arith.constant 0 : i32
    return %c0_i32, %c0_i32_0, %c0_i32_1 : i32, i32, i32
  }
  func.func @transform_3(%arg0: i32, %arg1: i32) -> (i32, i32) {
    %c0_i32 = arith.constant 0 : i32
    %c0_i32_0 = arith.constant 0 : i32
    %c0_i32_1 = arith.constant 0 : i32
    return %c0_i32, %c0_i32_0 : i32, i32
  }
  func.func @transform_4(%arg0: i32, %arg1: i32) -> (i32, i32, i32) {
    %c0_i32 = arith.constant 0 : i32
    %c0_i32_0 = arith.constant 0 : i32
    %c0_i32_1 = arith.constant 0 : i32
    %c0_i32_2 = arith.constant 0 : i32
    return %c0_i32, %c0_i32_0, %c0_i32_1 : i32, i32, i32
  }
  func.func @transform_5(%arg0: i32, %arg1: i32) -> (i32, i32) {
    %c0_i32 = arith.constant 0 : i32
    %c0_i32_0 = arith.constant 0 : i32
    %c0_i32_1 = arith.constant 0 : i32
    return %c0_i32, %c0_i32_0 : i32, i32
  }
  func.func @transform_6(%arg0: i32, %arg1: i32) -> (i32, i32, i32) {
    %c0_i32 = arith.constant 0 : i32
    %c0_i32_0 = arith.constant 0 : i32
    %c0_i32_1 = arith.constant 0 : i32
    %c0_i32_2 = arith.constant 0 : i32
    return %c0_i32, %c0_i32_0, %c0_i32_1 : i32, i32, i32
  }
  func.func @transform_7(%arg0: i32, %arg1: i32) -> (i32, i32) {
    %c0_i32 = arith.constant 0 : i32
    %c0_i32_0 = arith.constant 0 : i32
    %c0_i32_1 = arith.constant 0 : i32
    return %c0_i32, %c0_i32_0 : i32, i32
  }
  func.func @transform_8(%arg0: i32, %arg1: i32) -> (i32, i32, i32) {
    %c0_i32 = arith.constant 0 : i32
    %c0_i32_0 = arith.constant 0 : i32
    return %arg0, %c0_i32, %arg1 : i32, i32, i32
  }
  func.func @transform_9(%arg0: i32, %arg1: i32) -> (i32, i32, i32) {
    %c0_i32 = arith.constant 0 : i32
    %c0_i32_0 = arith.constant 0 : i32
    return %arg0, %c0_i32, %arg1 : i32, i32, i32
  }
}

</mosaic_0001>

<bundles_post_ra>
// kernel: tpu_custom_call.1
= control target key start
LH: loop header
LB: loop body
LE: loop exit
PB: predicated region body
PF: predicated region fallthrough
CT: control target
= control target key end

     0   :  { %s1858_s0 = inlined_call_operand.vmem [shape: f32[2,8,256], index: 0, kind: input, shape index: {}]   ;;  %s1859_s1 = inlined_call_operand.vmem [shape: f32[2,8,256], index: 1, kind: input, shape index: {}]   ;;  %s1860_s2 = inlined_call_operand.vmem [shape: f32[16,8,1], index: 2, kind: input, shape index: {}]   ;;  %s1861_s3 = inlined_call_operand.vmem [shape: f32[8,1], index: 3, kind: input, shape index: {}]   ;;  %s1862_s4 = inlined_call_operand.vmem [shape: f32[4,8,1], index: 4, kind: input, shape index: {}]   ;;  %s1863_s5 = inlined_call_operand.vmem [shape: f32[8,1], index: 5, kind: input, shape index: {}]   ;;  %s1864_s6 = inlined_call_operand.vmem [shape: f32[4,8,1], index: 6, kind: input, shape index: {}]   ;;  %s1865_s7 = inlined_call_operand.vmem [shape: f32[8,1], index: 7, kind: input, shape index: {}]   ;;  %s1866_s8 = inlined_call_operand.hbm [shape: f32[2,8,256], index: 8, kind: output, shape index: {0}]   ;;  %s1867_s9 = inlined_call_operand.hbm [shape: f32[2,8,256], index: 9, kind: output, shape index: {1}]  }
   0x1   :  { %1870 = sst [smem:[#allocation10_spill]] %s1858_s0 }
   0x2   :  { %1871 = sst [smem:[#allocation11_spill]] %s1861_s3 }
   0x3   :  { %15 = vsyncpa [#allocation3], 0 }
   0x4   :  { %17 = vsyncpa [#allocation3 + $0x1], 0 }
   0x5   :  { %18 = vsyncpa [#allocation5], 0 }
   0x6   :  { %20 = vsyncpa [#allocation5 + $0x1], 0  ;;  %s1493_s30 = smov 0   ;;  %s1495_s10 = smov 0  }
   0x7   :  { %s1497_s11 = smov 0   ;;  %s1499_s12 = smov 0  }
   0x8   :  { %s1501_s13 = smov 0   ;;  %s1503_s14 = smov 0  }
   0x9 LB: > { %1872 = sst [smem:[#allocation8_spill]] %s1436_s13  ;;  %s1188_s15 = sadd.s32 4294967295, %s1440_s14   ;;  %s1440_s14 = sphi %s1503_s14, %s26_s14   ;;  %s1436_s13 = sphi %s1501_s13, %s1879_s13   ;;  %s1432_s12 = sphi %s1499_s12, %s1878_s12   ;;  %s1428_s11 = sphi %s1497_s11, %s1882_s11   ;;  %s1424_s10 = sphi %s1495_s10, %s1881_s10   ;;  %s1420_s30 = sphi %s1493_s30, %s1880_s30  }
   0xa   : > { %s1189_s16 = sadd.s32 4294967294, %s1440_s14   ;;  %s38_s17 = sadd.s32 1, %s1436_s13 }
   0xb   : > { %s229_s18 = sadd.s32 1, %s1428_s11  ;;  %p40_p0 = scmp.ge.s32.totalorder %s38_s17, 2 }
   0xc   : > { %p239_p1 = scmp.ne.s32.totalorder %s1428_s11, %s1424_s10  ;;  %p240_p2 = scmp.eq.s32.totalorder %s1188_s15, 1 }
   0xd   : > { %p245_p3 = scmp.ne.s32.totalorder %s1424_s10, %s1420_s30  ;;  %s1884_s17 = smov (%p40_p0, %s38_s17), 0 }
   0xe   : > { %1873 = sst [smem:[#allocation9_spill]] %s1884_s17  ;;  %p1533_p4 = por %p240_p2, %p239_p1 }
   0xf   : > { %p246_p5 = scmp.eq.s32.totalorder %s1189_s16, 1  ;;  %s224_s20 = ssub.s32 %s1436_s13, %s1884_s17 }
  0x10   : > { %p1192_p6 = scmp.ge.s32.totalorder %s1440_s14, 1  ;;  %p227_p7 = scmp.eq.s32.totalorder %s224_s20, 0 }
  0x11   : > { %p1540_p8 = por %p246_p5, %p245_p3  ;;  %p336_p9 = scmp.lt.s32.totalorder %s1440_s14, 3 }
  0x12   : > { %s1546_s22 = scalar_select %p227_p7, %s1428_s11, %s229_s18  }
  0x13   : > { %p337_p10 = pnand %p1192_p6, %p336_p9 }
  0x14   : > { %s1876_s3 = sld [smem:[#allocation11_spill]] (!%p337_p10)  ;;  %p391_p11 = scmp.lt.s32.totalorder (!%p337_p10), %s1432_s12, 1 }
  0x15   : > { %340 = sbr.rel (%p337_p10) target bundleno = 331 (0x14b), region = 52  ;;  %s1877_s0 = sld [smem:[#allocation10_spill]] (!%p337_p10) }
  0x16   : > { %s1786_s20 = sand.u32 (!%p337_p10), 1, %s1424_s10   ;;  %s1240_s24 = sshll.u32 (!%p337_p10), %s1432_s12, 4 }
  0x17   : > { %s1193_s23 = sshll.u32 (!%p337_p10), %s1786_s20, 4  ;;  %s1797_s13 = scalar_lea.hbm (!%p337_p10), %s1866_s8, %s1240_s24 }
  0x18   : > { %s1040_s28 = sshll.u32 (!%p337_p10), %s1797_s13, 4  ;;  %s1041_s28 = int_to_ptr.hbm [resolvable:$true] %s1040_s28 }
  0x19   : > { %s1344_s25 = sshra.s32 (!%p337_p10), %s1041_s28, 4  ;;  %s1345_s25 = int_to_ptr.hbm [resolvable:$true] %s1344_s25 }
  0x1a   : > { %v1205_v0 = vld [vmem:[%s1860_s2 + $0x18] sm:$0xff]  ;;  %v1203_v1 = vld [vmem:[%s1860_s2 + $0x8] sm:$0xff]  ;;  %v529_v2 = vld [vmem:[%s1860_s2] sm:$0xff]  ;;  %v1442_v3 = vmov 0   ;;  %s392_s18 = scalar_select %p391_p11, %s1432_s12, 1 }
  0x1b   : > { %1309 = vset.pattern.permute.xlu2 %v1442_v3  ;;  %1308 = vset.pattern.permute.xlu1 %v1442_v3  ;;  %v1206_v4 = vld [vmem:[%s1860_s2 + $0x20] sm:$0xff]  ;;  %v1204_v5 = vld [vmem:[%s1860_s2 + $0x10] sm:$0xff]  ;;  %v1209_v7 = vld [vmem:[%s1860_s2 + $0x38] sm:$0xff]  ;;  %s1350_s12 = scalar_lea.hbm %s1866_s8, 32  ;;  %p1351_p1 = scmp.lt.s32.totalorder %s1345_s25, %s1866_s8 }
  0x1c   : > { %1307 = vset.pattern.permute.xlu0 %v1442_v3  ;;  %576 = vperm.xlu2 %1309, %v1205_v0   ;;  %v528_v6 = vld [vmem:[%s1876_s3] sm:$0xff]  ;;  %v1208_v8 = vld [vmem:[%s1860_s2 + $0x30] sm:$0xff]  ;;  %v1207_v9 = vld [vmem:[%s1860_s2 + $0x28] sm:$0xff]  ;;  %s1238_s26 = sshll.u32 %s392_s18, 4  ;;  %s1053_s18 = scalar_lea.hbm %s1867_s9, %s1240_s24 }
  0x1d   : > { %550 = vperm.xlu1 %1308, %v1203_v1   ;;  %532 = vperm.xlu0 %1307, %v529_v2   ;;  %v1212_v10 = vld [vmem:[%s1860_s2 + $0x50] sm:$0xff]  ;;  %v1211_v11 = vld [vmem:[%s1860_s2 + $0x48] sm:$0xff]  ;;  %v1210_v12 = vld [vmem:[%s1860_s2 + $0x40] sm:$0xff]  ;;  %s398_s29 = scalar_lea.vmem %s1877_s0, %s1238_s26  ;;  %s408_s16 = scalar_lea.vmem %s1859_s1, %s1238_s26 }
  0x1e   : > { %v1215_v13 = vld [vmem:[%s1860_s2 + $0x68] sm:$0xff]  ;;  %v1214_v14 = vld [vmem:[%s1860_s2 + $0x60] sm:$0xff]  ;;  %v1213_v15 = vld [vmem:[%s1860_s2 + $0x58] sm:$0xff]  ;;  %s382_s26 = scalar_lea.vmem [#allocation2], %s1193_s23  ;;  %s1018_s24 = scalar_lea.sflag [#allocation3], %s1786_s20 }
  0x1f   : > { %v1601_v16 = vld [vmem:[%s398_s29] sm:$0xff]  ;;  %v1603_v17 = vld [vmem:[%s398_s29 + $0x8] sm:$0xff]  ;;  %v1217_v33 = vld [vmem:[%s1860_s2 + $0x78] sm:$0xff]  ;;  %s1038_s27 = sshll.u32 %s382_s26, 4  ;;  %s389_s29 = scalar_lea.vmem [#allocation4], %s1193_s23  ;;  %s1039_s27 = int_to_ptr.vmem [resolvable:$true] %s1038_s27 }
  0x20   : > { %v1605_v18 = vld [vmem:[%s408_s16] sm:$0xff]  ;;  %v1607_v19 = vld [vmem:[%s408_s16 + $0x8] sm:$0xff]  ;;  %v1610_v20 = vand.u32 2147483647, %v1601_v16  ;;  %v1613_v21 = vand.u32 2147483647, %v1603_v17 }
  0x21   : > { %v1616_v22 = vand.u32 2147483647, %v1605_v18  ;;  %v1619_v23 = vand.u32 2147483647, %v1607_v19  ;;  %v877_v28 = vld [vmem:[%s1864_s6] sm:$0xff]  ;;  %v1216_v34 = vld [vmem:[%s1860_s2 + $0x70] sm:$0xff] }
  0x22   : > { %v1224_v38 = vld [vmem:[%s1864_s6 + $0x10] sm:$0xff]  ;;  %v1223_v40 = vld [vmem:[%s1864_s6 + $0x8] sm:$0xff]  ;;  %v876_v41 = vld [vmem:[%s1865_s7] sm:$0xff]  ;;  %vm516_vm8 = vcmp.lt.f32.partialorder %v1601_v16, 0.0  ;;  %vm517_vm9 = vcmp.lt.f32.partialorder %v1603_v17, 0.0  ;;  %vm522_vm10 = vcmp.lt.f32.partialorder %v1605_v18, 0.0 }
  0x23   : > { %v450_v24 = vmin.f32 %v1610_v20, %v1616_v22  ;;  %v451_v25 = vmin.f32 %v1613_v21, %v1619_v23  ;;  %v452_v26 = vmax.f32 %v1610_v20, %v1616_v22  ;;  %v453_v27 = vmax.f32 %v1613_v21, %v1619_v23  ;;  %v819_v52 = vld [vmem:[%s1863_s5] sm:$0xff]  ;;  %v1225_v56 = vld [vmem:[%s1864_s6 + $0x18] sm:$0xff]  ;;  %v1221_v2 = vld [vmem:[%s1862_s4 + $0x10] sm:$0xff]  ;;  %s1055_s15 = sshll.u32 %s389_s29, 4  ;;  %s1057_s16 = sshll.u32 %s1053_s18, 4  ;;  %s1807_s15 = int_to_ptr.vmem [resolvable:$true] %s1055_s15  ;;  %s1809_s16 = int_to_ptr.hbm [resolvable:$true] %s1057_s16 }
  0x24   : > { %589 = vperm.xlu2 %1309, %v1206_v4   ;;  %v820_v55 = vld [vmem:[%s1862_s4] sm:$0xff]  ;;  %v1222_v1 = vld [vmem:[%s1862_s4 + $0x18] sm:$0xff]  ;;  %v1220_v3 = vld [vmem:[%s1862_s4 + $0x8] sm:$0xff]  ;;  %vm510_vm6 = vcmp.gt.f32.partialorder %v1616_v22, %v1610_v20  ;;  %vm511_vm7 = vcmp.gt.f32.partialorder %v1619_v23, %v1613_v21  ;;  %vm523_vm11 = vcmp.lt.f32.partialorder %v1607_v19, 0.0  ;;  %s1346_s3 = scalar_lea.hbm %s1345_s25, 16 }
  0x25   : > { %563 = vperm.xlu1 %1308, %v1204_v5   ;;  %541 = vperm.xlu0 %1307, %v528_v6   ;;  %v454_v29 = vmax.f32 %v452_v26, 1e-30  ;;  %v455_v30 = vmax.f32 %v453_v27, 1e-30  ;;  %v468_v31 = vadd.f32 %v452_v26, %v450_v24  ;;  %v469_v32 = vadd.f32 %v453_v27, %v451_v25  ;;  %p1347_p12 = scmp.ne.s32.totalorder %s1345_s25, %s1346_s3  ;;  %p1352_p2 = scmp.lt.s32.totalorder %s1350_s12, %s1346_s3 }
  0x26   : > { %v466_v57 = vsub.f32 %v450_v24, %v452_v26  ;;  %v467_v58 = vsub.f32 %v451_v25, %v453_v27 }
  0x27   : > { %1310 = vrcp.f32 %v454_v29  ;;  %v470_v35 = vmax.f32 %v468_v31, 1e-30  ;;  %v471_v36 = vmax.f32 %v469_v32, 1e-30  ;;  %p1348_p13 = pnand %p1347_p12, %p1533_p4  ;;  %p1353_p3 = por %p1352_p2, %p1351_p1 }
  0x28   : > { %1312 = vrcp.f32 %v455_v30 }
  0x29   : > { %1314 = vrcp.f32 %v470_v35  ;;  %p1349_p0 = pneg %p1348_p13 }
  0x2a   : > { %1316 = vrcp.f32 %v471_v36 }
  0x2b   : > { %p1354_p5 = pnand %p1353_p3, %p1349_p0 }
  0x2c   : > { %628 = vperm.xlu2 %1309, %v1209_v7  }
  0x2d   : > { %615 = vperm.xlu1 %1308, %v1208_v8   ;;  %602 = vperm.xlu0 %1307, %v1207_v9   ;;  %v1311_v37 = vpop.eup %1310  ;;  %v416_v8 = vmul.f32 %v1601_v16, %v1601_v16  ;;  %v418_v9 = vmul.f32 %v1605_v18, %v1605_v18 }
  0x2e   : > { %v1313_v39 = vpop.eup %1312  ;;  %v458_v42 = vmul.f32 %v1311_v37, %v454_v29 }
  0x2f   : > { %v1315_v43 = vpop.eup %1314  ;;  %v459_v44 = vmul.f32 %v1313_v39, %v455_v30 }
  0x30   : > { %v1317_v45 = vpop.eup %1316  ;;  %v474_v46 = vmul.f32 %v1315_v43, %v470_v35  ;;  %v460_v47 = vsub.f32 2.0, %v458_v42 }
  0x31   : > { %v461_v48 = vsub.f32 2.0, %v459_v44  ;;  %v475_v49 = vmul.f32 %v1317_v45, %v471_v36 }
  0x32   : > { %v476_v50 = vsub.f32 2.0, %v474_v46  ;;  %v462_v53 = vmul.f32 %v1311_v37, %v460_v47 }
  0x33   : > { %v477_v51 = vsub.f32 2.0, %v475_v49  ;;  %v463_v54 = vmul.f32 %v1313_v39, %v461_v48 }
  0x34   : > { %667 = vperm.xlu2 %1309, %v1212_v10   ;;  %v478_v59 = vmul.f32 %v1315_v43, %v476_v50  ;;  %v1656_v61 = vmul.f32 %v462_v53, %v450_v24  ;;  %v417_v10 = vmul.f32 %v1603_v17, %v1603_v17 }
  0x35   : > { %654 = vperm.xlu1 %1308, %v1211_v11   ;;  %641 = vperm.xlu0 %1307, %v1210_v12   ;;  %v479_v60 = vmul.f32 %v1317_v45, %v477_v51  ;;  %v1658_v62 = vmul.f32 %v463_v54, %v451_v25  ;;  %v419_v11 = vmul.f32 %v1607_v19, %v1607_v19 }
  0x36   : > { %v480_v63 = vmul.f32 %v478_v59, %v466_v57  ;;  %vm482_vm0 = vcmp.gt.f32.partialorder %v1656_v61, 0.41421357 }
  0x37   : > { %v481_v0 = vmul.f32 %v479_v60, %v467_v58  ;;  %vm483_vm1 = vcmp.gt.f32.partialorder %v1658_v62, 0.41421357 }
  0x38   : > { %v484_v4 = vsel %vm482_vm0, %v480_v63, %v1656_v61 }
  0x39   : > { %v485_v5 = vsel %vm483_vm1, %v481_v0, %v1658_v62  ;;  %v486_v6 = vmul.f32 %v484_v4, %v484_v4 }
  0x3a   : > { %v487_v7 = vmul.f32 %v485_v5, %v485_v5 }
  0x3b   : > { %v488_v12 = vmul.f32 0.080537446, %v486_v6 }
  0x3c   : > { %706 = vperm.xlu2 %1309, %v1215_v13   ;;  %v489_v13 = vmul.f32 0.080537446, %v487_v7 }
  0x3d   : > { %693 = vperm.xlu1 %1308, %v1214_v14   ;;  %680 = vperm.xlu0 %1307, %v1213_v15   ;;  %v420_v14 = vadd.f32 %v418_v9, %v416_v8  ;;  %v421_v15 = vadd.f32 %v419_v11, %v417_v10  ;;  %v1199_v24 = vadd.f32 -0.13877685, %v488_v12 }
  0x3e   : > { %v1200_v25 = vadd.f32 -0.13877685, %v489_v13 }
  0x3f   : > { %1318 = vrsqrt.f32 %v420_v14  ;;  %v492_v26 = vmul.f32 %v1199_v24, %v486_v6  ;;  %vm429_vm2 = vcmp.eq.f32.partialorder %v420_v14, inf  ;;  %vm441_vm3 = vcmp.eq.f32.partialorder %v421_v15, inf }
  0x40   : > { %1320 = vrsqrt.f32 %v421_v15  ;;  %v493_v27 = vmul.f32 %v1200_v25, %v487_v7  ;;  %v432_v57 = vand.u32 2147483648, %v420_v14  ;;  %v444_v58 = vand.u32 2147483648, %v421_v15 }
  0x41   : > { %vm431_vm4 = vcmp.eq.f32.partialorder %v420_v14, 0.0  ;;  %vm443_vm5 = vcmp.eq.f32.partialorder %v421_v15, 0.0 }
  0x42   : > { %v495_v29 = vadd.f32 0.19977711, %v493_v27 }
  0x44   : > { %880 = vperm.xlu2 %1309, %v877_v28   ;;  %v494_v28 = vadd.f32 0.19977711, %v492_v26 }
  0x45   : > { %732 = vperm.xlu1 %1308, %v1217_v33   ;;  %719 = vperm.xlu0 %1307, %v1216_v34   ;;  %v1319_v30 = vpop.eup %1318  ;;  %v497_v33 = vmul.f32 %v495_v29, %v487_v7 }
  0x46   : > { %v1321_v31 = vpop.eup %1320  ;;  %v496_v32 = vmul.f32 %v494_v28, %v486_v6  ;;  %v423_v34 = vmul.f32 %v1319_v30, %v420_v14 }
  0x47   : > { %v435_v35 = vmul.f32 %v1321_v31, %v421_v15  ;;  %v1202_v37 = vadd.f32 -0.3333295, %v497_v33 }
  0x48   : > { %v1201_v36 = vadd.f32 -0.3333295, %v496_v32 }
  0x49   : > { %v436_v39 = vmul.f32 %v1321_v31, %v435_v35 }
  0x4b   : > { %v437_v43 = vmul.f32 0.5, %v436_v39 }
  0x4c   : > { %911 = vperm.xlu2 %1309, %v1224_v38   ;;  %v424_v38 = vmul.f32 %v1319_v30, %v423_v34 }
  0x4d   : > { %898 = vperm.xlu1 %1308, %v1223_v40   ;;  %889 = vperm.xlu0 %1307, %v876_v41   ;;  %v500_v40 = vmul.f32 %v1201_v36, %v486_v6  ;;  %v501_v41 = vmul.f32 %v1202_v37, %v487_v7  ;;  %v438_v47 = vsub.f32 1.5, %v437_v43 }
  0x4e   : > { %v425_v42 = vmul.f32 0.5, %v424_v38 }
  0x4f   : > { %v502_v44 = vmul.f32 %v500_v40, %v484_v4  ;;  %v503_v45 = vmul.f32 %v501_v41, %v485_v5  ;;  %v439_v51 = vmul.f32 %v1321_v31, %v438_v47 }
  0x50   : > { %v426_v46 = vsub.f32 1.5, %v425_v42 }
  0x51   : > { %v504_v48 = vadd.f32 %v502_v44, %v484_v4  ;;  %v505_v49 = vadd.f32 %v503_v45, %v485_v5 }
  0x52   : > { %v427_v50 = vmul.f32 %v1319_v30, %v426_v46 }
  0x53   : > { %v507_v53 = vadd.f32 0.7853982, %v505_v49 }
  0x54   : > { %832 = vperm.xlu2 %1309, %v819_v52   ;;  %v506_v52 = vadd.f32 0.7853982, %v504_v48  ;;  %v428_v54 = vmul.f32 %v427_v50, %v420_v14 }
  0x55   : > { %823 = vperm.xlu1 %1308, %v820_v55   ;;  %924 = vperm.xlu0 %1307, %v1225_v56   ;;  %v440_v55 = vmul.f32 %v439_v51, %v421_v15  ;;  %v509_v60 = vsel %vm483_vm1, %v507_v53, %v505_v49 }
  0x56   : > { %v508_v59 = vsel %vm482_vm0, %v506_v52, %v504_v48  ;;  %v430_v63 = vsel %vm429_vm2, %v420_v14, %v428_v54 }
  0x57   : > { %v442_v0 = vsel %vm441_vm3, %v421_v15, %v440_v55 }
  0x58   : > { %v1691_v4 = vsel %vm443_vm5, %v444_v58, %v442_v0 }
  0x59   : > { %v536_v8 = vperm.slane %v1691_v4, 0  ;;  %v554_v11 = vperm.slane %v1691_v4, 1  ;;  %v567_v13 = vperm.slane %v1691_v4, 2  ;;  %v580_v15 = vperm.slane %v1691_v4, 3 }
  0x5a   : > { %v593_v31 = vperm.slane %v1691_v4, 4  ;;  %v606_v45 = vperm.slane %v1691_v4, 5  ;;  %v619_v51 = vperm.slane %v1691_v4, 6  ;;  %v632_v58 = vperm.slane %v1691_v4, 7 }
  0x5c   : > { %867 = vperm.xlu2 %1309, %v1222_v1   ;;  %v512_v1 = vsub.f32 1.5707964, %v508_v59 }
  0x5d   : > { %854 = vperm.xlu1 %1308, %v1221_v2   ;;  %841 = vperm.xlu0 %1307, %v1220_v3   ;;  %v513_v2 = vsub.f32 1.5707964, %v509_v60  ;;  %v1689_v3 = vsel %vm431_vm4, %v432_v57, %v430_v63 }
  0x5e   : > { %v514_v62 = vsel %vm510_vm6, %v512_v1, %v508_v59  ;;  %v535_v7 = vperm.slane %v1689_v3, 0  ;;  %v553_v10 = vperm.slane %v1689_v3, 1  ;;  %v566_v12 = vperm.slane %v1689_v3, 2 }
  0x5f   : > { %v515_v6 = vsel %vm511_vm7, %v513_v2, %v509_v60  ;;  %v518_v20 = vsub.f32 3.1415927, %v514_v62  ;;  %v579_v14 = vperm.slane %v1689_v3, 3  ;;  %v592_v30 = vperm.slane %v1689_v3, 4 }
  0x60   : > { %v519_v22 = vsub.f32 3.1415927, %v515_v6  ;;  %v605_v44 = vperm.slane %v1689_v3, 5  ;;  %v618_v50 = vperm.slane %v1689_v3, 6  ;;  %v631_v57 = vperm.slane %v1689_v3, 7 }
  0x61   : > { %v520_v32 = vsel %vm516_vm8, %v518_v20, %v514_v62 }
  0x62   : > { %v521_v33 = vsel %vm517_vm9, %v519_v22, %v515_v6  ;;  %v524_v42 = vsub.f32 0.0, %v520_v32 }
  0x63   : > { %v525_v43 = vsub.f32 0.0, %v521_v33 }
  0x64   : > { %v1721_v59 = vsel %vm522_vm10, %v524_v42, %v520_v32 }
  0x65   : > { %v1723_v60 = vsel %vm523_vm11, %v525_v43, %v521_v33  ;;  %v644_v1 = vperm.slane %v1721_v59, 0  ;;  %v657_v3 = vperm.slane %v1721_v59, 1 }
  0x66   : > { %v645_v2 = vperm.slane %v1723_v60, 0  ;;  %v658_v4 = vperm.slane %v1723_v60, 1 }
  0x76   : > { %v577_v56 = vpop.permute.xlu2 %576 }
  0x77   : > { %v581_v38 = vmul.f32 %v579_v14, %v577_v56  ;;  %v582_v39 = vmul.f32 %v580_v15, %v577_v56 }
  0x7e   : > { %v590_v9 = vpop.permute.xlu2 %589 }
  0x7f   : > { %v594_v46 = vmul.f32 %v592_v30, %v590_v9  ;;  %v595_v16 = vmul.f32 %v593_v31, %v590_v9  ;;  %v696_v30 = vperm.slane %v1721_v59, 4  ;;  %v697_v31 = vperm.slane %v1723_v60, 4 }
  0x86   : > { %v629_v47 = vpop.permute.xlu2 %628 }
  0x87   : > { %v633_v62 = vmul.f32 %v631_v57, %v629_v47  ;;  %v634_v6 = vmul.f32 %v632_v58, %v629_v47  ;;  %v723_v47 = vperm.slane %v1723_v60, 6 }
  0x8e   : > { %v668_v22 = vpop.permute.xlu2 %667 }
  0x8f   : > { %v551_v61 = vpop.permute.xlu1 %550  ;;  %v533_v5 = vpop.permute.xlu0 %532 }
  0x90   : > { %v537_v21 = vmul.f32 %v535_v7, %v533_v5  ;;  %v538_v23 = vmul.f32 %v536_v8, %v533_v5  ;;  %v555_v26 = vmul.f32 %v553_v10, %v551_v61  ;;  %v556_v27 = vmul.f32 %v554_v11, %v551_v61 }
  0x97   : > { %v564_v24 = vpop.permute.xlu1 %563  ;;  %v542_v25 = vpop.permute.xlu0 %541 }
  0x98   : > { %v544_v28 = vadd.f32 %v542_v25, %v537_v21  ;;  %v545_v29 = vadd.f32 %v542_v25, %v538_v23  ;;  %v568_v34 = vmul.f32 %v566_v12, %v564_v24  ;;  %v569_v35 = vmul.f32 %v567_v13, %v564_v24 }
  0x99   : > { %v670_v21 = vperm.slane %v1721_v59, 2  ;;  %v671_v23 = vperm.slane %v1723_v60, 2 }
  0x9a   : > { %v557_v36 = vadd.f32 %v555_v26, %v544_v28  ;;  %v558_v37 = vadd.f32 %v556_v27, %v545_v29  ;;  %v683_v26 = vperm.slane %v1721_v59, 3  ;;  %v684_v27 = vperm.slane %v1723_v60, 3 }
  0x9b   : > { %v672_v28 = vmul.f32 %v670_v21, %v668_v22  ;;  %v673_v29 = vmul.f32 %v671_v23, %v668_v22 }
  0x9c   : > { %v570_v40 = vadd.f32 %v568_v34, %v557_v36  ;;  %v571_v41 = vadd.f32 %v569_v35, %v558_v37 }
  0x9e   : > { %v583_v48 = vadd.f32 %v581_v38, %v570_v40  ;;  %v584_v17 = vadd.f32 %v582_v39, %v571_v41  ;;  %v709_v38 = vperm.slane %v1721_v59, 5  ;;  %v710_v39 = vperm.slane %v1723_v60, 5 }
  0x9f   : > { %v616_v49 = vpop.permute.xlu1 %615  ;;  %v603_v52 = vpop.permute.xlu0 %602 }
  0xa0   : > { %v596_v53 = vadd.f32 %v594_v46, %v583_v48  ;;  %v597_v54 = vadd.f32 %v595_v16, %v584_v17  ;;  %v607_v55 = vmul.f32 %v605_v44, %v603_v52  ;;  %v608_v56 = vmul.f32 %v606_v45, %v603_v52  ;;  %v707_v44 = vpop.permute.xlu2 %706 }
  0xa1   : > { %v620_v18 = vmul.f32 %v618_v50, %v616_v49  ;;  %v621_v19 = vmul.f32 %v619_v51, %v616_v49  ;;  %v722_v16 = vperm.slane %v1721_v59, 6  ;;  %v711_v48 = vmul.f32 %v709_v38, %v707_v44 }
  0xa2   : > { %v609_v63 = vadd.f32 %v607_v55, %v596_v53  ;;  %v610_v0 = vadd.f32 %v608_v56, %v597_v54  ;;  %v712_v17 = vmul.f32 %v710_v39, %v707_v44  ;;  %v735_v49 = vperm.slane %v1721_v59, 7 }
  0xa3   : > { %v736_v50 = vperm.slane %v1723_v60, 7 }
  0xa4   : > { %v622_v61 = vadd.f32 %v620_v18, %v609_v63  ;;  %v623_v5 = vadd.f32 %v621_v19, %v610_v0 }
  0xa6   : > { %v635_v9 = vadd.f32 %v633_v62, %v622_v61  ;;  %v636_v10 = vadd.f32 %v634_v6, %v623_v5 }
  0xa7   : > { %v655_v7 = vpop.permute.xlu1 %654  ;;  %v642_v8 = vpop.permute.xlu0 %641 }
  0xa8   : > { %v646_v11 = vmul.f32 %v644_v1, %v642_v8  ;;  %v647_v20 = vmul.f32 %v645_v2, %v642_v8  ;;  %v659_v12 = vmul.f32 %v657_v3, %v655_v7  ;;  %v660_v13 = vmul.f32 %v658_v4, %v655_v7 }
  0xaa   : > { %v648_v14 = vadd.f32 %v646_v11, %v635_v9  ;;  %v649_v15 = vadd.f32 %v647_v20, %v636_v10 }
  0xac   : > { %v661_v24 = vadd.f32 %v659_v12, %v648_v14  ;;  %v662_v25 = vadd.f32 %v660_v13, %v649_v15 }
  0xae   : > { %v674_v34 = vadd.f32 %v672_v28, %v661_v24  ;;  %v675_v35 = vadd.f32 %v673_v29, %v662_v25 }
  0xaf   : > { %v694_v32 = vpop.permute.xlu1 %693  ;;  %v681_v33 = vpop.permute.xlu0 %680 }
  0xb0   : > { %v685_v36 = vmul.f32 %v683_v26, %v681_v33  ;;  %v686_v37 = vmul.f32 %v684_v27, %v681_v33  ;;  %v698_v40 = vmul.f32 %v696_v30, %v694_v32  ;;  %v699_v41 = vmul.f32 %v697_v31, %v694_v32 }
  0xb2   : > { %v687_v42 = vadd.f32 %v685_v36, %v674_v34  ;;  %v688_v43 = vadd.f32 %v686_v37, %v675_v35 }
  0xb4   : > { %v700_v45 = vadd.f32 %v698_v40, %v687_v42  ;;  %v701_v46 = vadd.f32 %v699_v41, %v688_v43 }
  0xb6   : > { %v713_v53 = vadd.f32 %v711_v48, %v700_v45  ;;  %v714_v54 = vadd.f32 %v712_v17, %v701_v46 }
  0xb7   : > { %v733_v51 = vpop.permute.xlu1 %732  ;;  %v720_v52 = vpop.permute.xlu0 %719 }
  0xb8   : > { %v724_v55 = vmul.f32 %v722_v16, %v720_v52  ;;  %v725_v56 = vmul.f32 %v723_v47, %v720_v52  ;;  %v737_v57 = vmul.f32 %v735_v49, %v733_v51  ;;  %v738_v58 = vmul.f32 %v736_v50, %v733_v51 }
  0xba   : > { %v726_v18 = vadd.f32 %v724_v55, %v713_v53  ;;  %v727_v19 = vadd.f32 %v725_v56, %v714_v54 }
  0xbc   : > { %v1741_v63 = vadd.f32 %v737_v57, %v726_v18  ;;  %v1743_v0 = vadd.f32 %v738_v58, %v727_v19 }
  0xbe   : > { %v1746_v1 = vmul.f32 0.70710677, %v1741_v63  ;;  %v1749_v59 = vmul.f32 0.70710677, %v1743_v0 }
  0xc0   : > { %v745_v60 = vand.u32 2147483647, %v1746_v1  ;;  %v746_v2 = vand.u32 2147483647, %v1749_v59  ;;  %vm807_vm12 = vcmp.ge.f32.partialorder %v1746_v1, 0.0  ;;  %vm808_vm13 = vcmp.ge.f32.partialorder %v1749_v59, 0.0 }
  0xc2   : > { %v747_v61 = vmul.f32 0.5, %v745_v60  ;;  %v748_v5 = vmul.f32 0.5, %v746_v2  ;;  %v795_v47 = vsub.f32 0.0, %v745_v60  ;;  %v796_v17 = vsub.f32 0.0, %v746_v2 }
  0xc4   : > { %v749_v62 = vadd.f32 1.0, %v747_v61  ;;  %v750_v6 = vadd.f32 1.0, %v748_v5  ;;  %v797_v52 = vmul.f32 %v795_v47, %v745_v60  ;;  %v798_v54 = vmul.f32 %v796_v17, %v746_v2 }
  0xc5   : > { %v741_v2 = vmul.f32 0.5, %v1741_v63 }
  0xc6   : > { %1322 = vrcp.f32 %v749_v62 }
  0xc7   : > { %1324 = vrcp.f32 %v750_v6 }
  0xcc   : > { %v1323_v3 = vpop.eup %1322 }
  0xcd   : > { %v1325_v4 = vpop.eup %1324  ;;  %v753_v7 = vmul.f32 %v1323_v3, %v749_v62 }
  0xce   : > { %v754_v8 = vmul.f32 %v1325_v4, %v750_v6 }
  0xcf   : > { %v755_v9 = vsub.f32 2.0, %v753_v7  ;;  %v881_v7 = vpop.permute.xlu2 %880 }
  0xd0   : > { %v756_v10 = vsub.f32 2.0, %v754_v8 }
  0xd1   : > { %v757_v11 = vmul.f32 %v1323_v3, %v755_v9 }
  0xd2   : > { %v758_v20 = vmul.f32 %v1325_v4, %v756_v10  ;;  %v742_v10 = vmul.f32 0.5, %v1743_v0 }
  0xd3   : > { %v759_v22 = vmul.f32 0.17087276, %v757_v11 }
  0xd4   : > { %v760_v21 = vmul.f32 0.17087276, %v758_v20 }
  0xd5   : > { %v761_v23 = vadd.f32 -0.82215226, %v759_v22 }
  0xd6   : > { %v762_v12 = vadd.f32 -0.82215226, %v760_v21  ;;  %v890_v21 = vpop.permute.xlu0 %889 }
  0xd7   : > { %v763_v13 = vmul.f32 %v761_v23, %v757_v11 }
  0xd8   : > { %v764_v14 = vmul.f32 %v762_v12, %v758_v20 }
  0xd9   : > { %v765_v15 = vadd.f32 1.4885159, %v763_v13 }
  0xda   : > { %v766_v24 = vadd.f32 1.4885159, %v764_v14  ;;  %v899_v14 = vpop.permute.xlu1 %898 }
  0xdb   : > { %v767_v25 = vmul.f32 %v765_v15, %v757_v11 }
  0xdc   : > { %v768_v26 = vmul.f32 %v766_v24, %v758_v20 }
  0xdd   : > { %v769_v27 = vadd.f32 -1.135204, %v767_v25 }
  0xde   : > { %v770_v28 = vadd.f32 -1.135204, %v768_v26 }
  0xdf   : > { %v771_v29 = vmul.f32 %v769_v27, %v757_v11  ;;  %v912_v27 = vpop.permute.xlu2 %911 }
  0xe0   : > { %v772_v30 = vmul.f32 %v770_v28, %v758_v20 }
  0xe1   : > { %v773_v31 = vadd.f32 0.27886808, %v771_v29 }
  0xe2   : > { %v774_v32 = vadd.f32 0.27886808, %v772_v30 }
  0xe3   : > { %v775_v33 = vmul.f32 %v773_v31, %v757_v11 }
  0xe4   : > { %v776_v34 = vmul.f32 %v774_v32, %v758_v20 }
  0xe5   : > { %v777_v35 = vadd.f32 -0.18628806, %v775_v33 }
  0xe6   : > { %v778_v36 = vadd.f32 -0.18628806, %v776_v34  ;;  %v925_v34 = vpop.permute.xlu0 %924 }
  0xe7   : > { %v779_v37 = vmul.f32 %v777_v35, %v757_v11 }
  0xe8   : > { %v780_v38 = vmul.f32 %v778_v36, %v758_v20 }
  0xe9   : > { %v781_v39 = vadd.f32 0.09678418, %v779_v37 }
  0xea   : > { %v782_v40 = vadd.f32 0.09678418, %v780_v38 }
  0xeb   : > { %v783_v41 = vmul.f32 %v781_v39, %v757_v11 }
  0xec   : > { %v784_v42 = vmul.f32 %v782_v40, %v758_v20 }
  0xed   : > { %v785_v43 = vadd.f32 0.37409195, %v783_v41 }
  0xee   : > { %v786_v44 = vadd.f32 0.37409195, %v784_v42 }
  0xef   : > { %v787_v45 = vmul.f32 %v785_v43, %v757_v11 }
  0xf0   : > { %v788_v46 = vmul.f32 %v786_v44, %v758_v20 }
  0xf1   : > { %v789_v16 = vadd.f32 1.0000237, %v787_v45 }
  0xf2   : > { %v790_v48 = vadd.f32 1.0000237, %v788_v46 }
  0xf3   : > { %v791_v49 = vmul.f32 %v789_v16, %v757_v11 }
  0xf4   : > { %v792_v50 = vmul.f32 %v790_v48, %v758_v20  ;;  %v824_v48 = vpop.permute.xlu1 %823 }
  0xf5   : > { %v793_v51 = vadd.f32 -1.2655122, %v791_v49 }
  0xf6   : > { %v794_v53 = vadd.f32 -1.2655122, %v792_v50 }
  0xf7   : > { %v799_v55 = vadd.f32 %v797_v52, %v793_v51 }
  0xf8   : > { %v800_v56 = vadd.f32 %v798_v54, %v794_v53 }
  0xf9   : > { %v801_v57 = vmul.f32 1.442695, %v799_v55 }
  0xfa   : > { %v803_v58 = vmul.f32 1.442695, %v800_v56  ;;  %v833_v56 = vpop.permute.xlu2 %832 }
  0xfb   : > { %1326 = vpow2.f32 %v801_v57 }
  0xfc   : > { %1328 = vpow2.f32 %v803_v58 }
 0x101   : > { %v1327_v18 = vpop.eup %1326 }
 0x102   : > { %v1329_v19 = vpop.eup %1328  ;;  %v805_v61 = vmul.f32 %v1327_v18, %v757_v11 }
 0x103   : > { %v806_v5 = vmul.f32 %v1329_v19, %v758_v20 }
 0x104   : > { %v809_v62 = vsub.f32 1.0, %v805_v61  ;;  %v1218_v6 = vadd.f32 -1.0, %v805_v61 }
 0x105   : > { %v810_v3 = vsub.f32 1.0, %v806_v5  ;;  %v1219_v4 = vadd.f32 -1.0, %v806_v5 }
 0x106   : > { %v813_v60 = vsel %vm807_vm12, %v809_v62, %v1218_v6 }
 0x107   : > { %v814_v8 = vsel %vm808_vm13, %v810_v3, %v1219_v4  ;;  %v815_v9 = vadd.f32 1.0, %v813_v60 }
 0x108   : > { %v816_v22 = vadd.f32 1.0, %v814_v8 }
 0x109   : > { %v1757_v11 = vmul.f32 %v815_v9, %v741_v2  ;;  %v842_v9 = vpop.permute.xlu0 %841 }
 0x10a   : > { %v1759_v20 = vmul.f32 %v816_v22, %v742_v10 }
 0x10b   : > { %v901_v1 = vperm.slane %v1757_v11, 5  ;;  %v883_v23 = vperm.slane %v1757_v11, 4  ;;  %v914_v63 = vperm.slane %v1757_v11, 6  ;;  %v927_v26 = vperm.slane %v1757_v11, 7 }
 0x10c   : > { %v902_v12 = vperm.slane %v1759_v20, 5  ;;  %v884_v59 = vperm.slane %v1759_v20, 4  ;;  %v915_v0 = vperm.slane %v1759_v20, 6  ;;  %v928_v30 = vperm.slane %v1759_v20, 7 }
 0x10d   : > { %v885_v13 = vmul.f32 %v883_v23, %v881_v7  ;;  %v903_v24 = vmul.f32 %v901_v1, %v899_v14  ;;  %v916_v32 = vmul.f32 %v914_v63, %v912_v27  ;;  %v929_v37 = vmul.f32 %v927_v26, %v925_v34  ;;  %v855_v23 = vpop.permute.xlu1 %854 }
 0x10e   : > { %v886_v15 = vmul.f32 %v884_v59, %v881_v7  ;;  %v904_v28 = vmul.f32 %v902_v12, %v899_v14  ;;  %v917_v35 = vmul.f32 %v915_v0, %v912_v27  ;;  %v930_v39 = vmul.f32 %v928_v30, %v925_v34 }
 0x10f   : > { %v892_v25 = vadd.f32 %v890_v21, %v885_v13  ;;  %v826_v17 = vperm.slane %v1757_v11, 0  ;;  %v827_v52 = vperm.slane %v1759_v20, 0  ;;  %v844_v5 = vperm.slane %v1757_v11, 1 }
 0x110   : > { %v893_v29 = vadd.f32 %v890_v21, %v886_v15  ;;  %v857_v6 = vperm.slane %v1757_v11, 2  ;;  %v858_v8 = vperm.slane %v1759_v20, 2  ;;  %v845_v10 = vperm.slane %v1759_v20, 1 }
 0x111   : > { %v905_v31 = vadd.f32 %v903_v24, %v892_v25  ;;  %v828_v57 = vmul.f32 %v826_v17, %v824_v48  ;;  %v829_v19 = vmul.f32 %v827_v52, %v824_v48  ;;  %v846_v12 = vmul.f32 %v844_v5, %v842_v9 }
 0x112   : > { %v906_v33 = vadd.f32 %v904_v28, %v893_v29  ;;  %v859_v63 = vmul.f32 %v857_v6, %v855_v23  ;;  %v870_v14 = vperm.slane %v1757_v11, 3  ;;  %v860_v28 = vmul.f32 %v858_v8, %v855_v23 }
 0x113   : > { %v918_v36 = vadd.f32 %v916_v32, %v905_v31  ;;  %v835_v4 = vadd.f32 %v833_v56, %v828_v57  ;;  %v836_v21 = vadd.f32 %v833_v56, %v829_v19  ;;  %v847_v29 = vmul.f32 %v845_v10, %v842_v9  ;;  %v868_v31 = vpop.permute.xlu2 %867 }
 0x114   : > { %v919_v38 = vadd.f32 %v917_v35, %v906_v33  ;;  %v871_v34 = vperm.slane %v1759_v20, 3 }
 0x115   : > { %v931_v40 = vadd.f32 %v929_v37, %v918_v36  ;;  %v848_v25 = vadd.f32 %v846_v12, %v835_v4  ;;  %v849_v37 = vadd.f32 %v847_v29, %v836_v21 }
 0x116   : > { %v932_v41 = vadd.f32 %v930_v39, %v919_v38  ;;  %v872_v38 = vmul.f32 %v870_v14, %v868_v31 }
 0x117   : > { %v933_v42 = vmul.f32 0.63661975, %v931_v40  ;;  %v862_v17 = vadd.f32 %v860_v28, %v849_v37 }
 0x118   : > { %v934_v43 = vmul.f32 0.63661975, %v932_v41 }
 0x119   : > { %v935_v44 = vadd.f32 0.5, %v933_v42 }
 0x11a   : > { %v936_v45 = vadd.f32 0.5, %v934_v43 }
 0x11b   : > { %v937_v46 = vfloor.f32 %v935_v44 }
 0x11c   : > { %v938_v16 = vfloor.f32 %v936_v45 }
 0x11d   : > { %v939_v47 = vmul.f32 1.5707964, %v937_v46  ;;  %v943_v51 = vmul.f32 -4.371139e-08, %v937_v46  ;;  %v1243_v24 = vcvt.f32.s32 %v937_v46 }
 0x11e   : > { %v940_v49 = vmul.f32 1.5707964, %v938_v16  ;;  %v944_v54 = vmul.f32 -4.371139e-08, %v938_v16  ;;  %v1245_v33 = vcvt.f32.s32 %v938_v16 }
 0x11f   : > { %v941_v50 = vsub.f32 %v931_v40, %v939_v47  ;;  %v861_v40 = vadd.f32 %v859_v63, %v848_v25  ;;  %v983_v42 = vand.u32 1, %v1243_v24  ;;  %v991_v46 = vadd.s32 1, %v1243_v24 }
 0x120   : > { %v942_v53 = vsub.f32 %v932_v41, %v940_v49  ;;  %v992_v48 = vadd.s32 1, %v1245_v33 }
 0x121   : > { %v1771_v55 = vsub.f32 %v941_v50, %v943_v51  ;;  %v984_v50 = vand.u32 1, %v1245_v33  ;;  %v873_v51 = vmul.f32 %v871_v34, %v868_v31  ;;  %v874_v52 = vadd.f32 %v872_v38, %v861_v40 }
 0x122   : > { %v1773_v58 = vsub.f32 %v942_v53, %v944_v54  ;;  %v987_v54 = vand.u32 2, %v1243_v24  ;;  %v993_v19 = vand.u32 2, %v991_v46  ;;  %vm985_vm14 = vcmp.eq.s32.totalorder %v983_v42, 1 }
 0x123   : > { %v947_v18 = vmul.f32 %v1771_v55, %v1771_v55  ;;  %v875_v6 = vadd.f32 %v873_v51, %v862_v17  ;;  %vm986_vm15 = vcmp.eq.s32.totalorder %v984_v50, 1 }
 0x124   : > { %v948_v61 = vmul.f32 %v1773_v58, %v1773_v58  ;;  %vm995_vm0 = vcmp.eq.s32.totalorder %v993_v19, 2  ;;  %vm989_vm1 = vcmp.eq.s32.totalorder %v987_v54, 2 }
 0x125   : > { %v949_v62 = vmul.f32 -0.00019515296, %v947_v18  ;;  %v963_v3 = vmul.f32 2.4433157e-05, %v947_v18  ;;  %v975_v45 = vmul.f32 0.5, %v947_v18 }
 0x126   : > { %v950_v7 = vmul.f32 -0.00019515296, %v948_v61  ;;  %v964_v60 = vmul.f32 2.4433157e-05, %v948_v61  ;;  %v976_v47 = vmul.f32 0.5, %v948_v61 }
 0x127   : > { %v951_v2 = vadd.f32 0.008332161, %v949_v62  ;;  %v1228_v22 = vadd.f32 -0.0013887316, %v963_v3 }
 0x128   : > { %v952_v1 = vadd.f32 0.008332161, %v950_v7  ;;  %v1229_v59 = vadd.f32 -0.0013887316, %v964_v60 }
 0x129   : > { %v953_v13 = vmul.f32 %v951_v2, %v947_v18  ;;  %v967_v15 = vmul.f32 %v1228_v22, %v947_v18 }
 0x12a   : > { %v954_v0 = vmul.f32 %v952_v1, %v948_v61  ;;  %v968_v26 = vmul.f32 %v1229_v59, %v948_v61 }
 0x12b   : > { %v1226_v27 = vadd.f32 -0.16666655, %v953_v13  ;;  %v969_v30 = vadd.f32 0.041666646, %v967_v15 }
 0x12c   : > { %v1227_v32 = vadd.f32 -0.16666655, %v954_v0  ;;  %v970_v35 = vadd.f32 0.041666646, %v968_v26 }
 0x12d   : > { %v957_v36 = vmul.f32 %v1226_v27, %v947_v18  ;;  %v971_v11 = vmul.f32 %v969_v30, %v947_v18 }
 0x12e   : > { %v958_v39 = vmul.f32 %v1227_v32, %v948_v61  ;;  %v972_v41 = vmul.f32 %v970_v35, %v948_v61 }
 0x12f   : > { %v959_v43 = vmul.f32 %v957_v36, %v1771_v55  ;;  %v973_v44 = vmul.f32 %v971_v11, %v947_v18  ;;  %v988_v18 = vand.u32 2, %v1245_v33 }
 0x130   : > { %v960_v20 = vmul.f32 %v958_v39, %v1773_v58  ;;  %v974_v16 = vmul.f32 %v972_v41, %v948_v61  ;;  %v994_v61 = vand.u32 2, %v992_v48 }
 0x131   : > { %v977_v49 = vsub.f32 %v973_v44, %v975_v45  ;;  %v961_v56 = vadd.f32 %v959_v43, %v1771_v55  ;;  %vm990_vm3 = vcmp.eq.s32.totalorder %v988_v18, 2 }
 0x132   : > { %v978_v53 = vsub.f32 %v974_v16, %v976_v47  ;;  %v962_v5 = vadd.f32 %v960_v20, %v1773_v58  ;;  %vm996_vm2 = vcmp.eq.s32.totalorder %v994_v61, 2 }
 0x133   : > { %v979_v57 = vadd.f32 1.0, %v977_v49 }
 0x134   : > { %v980_v62 = vadd.f32 1.0, %v978_v53 }
 0x135   : > { %v1003_v3 = vsel %vm985_vm14, %v961_v56, %v979_v57  ;;  %v997_v4 = vsel %vm985_vm14, %v979_v57, %v961_v56 }
 0x136   : > { %v1004_v55 = vsel %vm986_vm15, %v962_v5, %v980_v62  ;;  %v1005_v7 = vsub.f32 0.0, %v1003_v3  ;;  %v998_v60 = vsel %vm986_vm15, %v980_v62, %v962_v5  ;;  %v999_v2 = vsub.f32 0.0, %v997_v4 }
 0x137   : > { %v1006_v58 = vsub.f32 0.0, %v1004_v55  ;;  %v1000_v8 = vsub.f32 0.0, %v998_v60 }
 0x138   : > { %v1007_v9 = vsel %vm995_vm0, %v1005_v7, %v1003_v3  ;;  %v1001_v10 = vsel %vm989_vm1, %v999_v2, %v997_v4 }
 0x139   : > { %v1008_v22 = vsel %vm996_vm2, %v1006_v58, %v1004_v55  ;;  %v1009_v21 = vmul.f32 %v1007_v9, %v874_v52  ;;  %v1002_v1 = vsel %vm990_vm3, %v1000_v8, %v998_v60  ;;  %v1013_v23 = vmul.f32 %v1001_v10, %v874_v52 }
 0x13a   : > { %v1010_v12 = vmul.f32 %v1008_v22, %v875_v6  ;;  %v1014_v59 = vmul.f32 %v1002_v1, %v875_v6 }
 0x13b   : > { %1011 = vst [vmem:[%s382_s26] sm:$0xff] %v1009_v21 }
 0x13c   : > { %1012 = vst [vmem:[%s382_s26 + $0x8] sm:$0xff] %v1010_v12 }
 0x13d   : > { %1357 = shalt.err (!%p1354_p5)
}
 0x13e   : > { %1246 = dma.vmem_to_hbm [thread:$0]  (%p1533_p4), %s1039_s27, 256, %s1041_s28, %s1018_s24   ;;  %1015 = vst [vmem:[%s389_s29] sm:$0xff] %v1013_v23 }
 0x13f   : > { %1016 = vst [vmem:[%s389_s29 + $0x8] sm:$0xff] %v1014_v59  ;;  %s1023_s26 = scalar_lea.sflag [#allocation5], %s1786_s20  ;;  %s1372_s0 = sshra.s32 %s1809_s16, 4  ;;  %s1373_s0 = int_to_ptr.hbm [resolvable:$true] %s1372_s0 }
 0x140   : > { %s1374_s23 = scalar_lea.hbm %s1373_s0, 16  ;;  %s1378_s13 = scalar_lea.hbm %s1867_s9, 32 }
 0x141   : > { %p1375_p6 = scmp.ne.s32.totalorder %s1373_s0, %s1374_s23  ;;  %p1379_p10 = scmp.lt.s32.totalorder %s1373_s0, %s1867_s9 }
 0x142   : > { %p1380_p11 = scmp.lt.s32.totalorder %s1378_s13, %s1374_s23 }
 0x143   : > { %p1376_p7 = pnand %p1375_p6, %p1533_p4 }
 0x144   : > { %p1381_p12 = por %p1380_p11, %p1379_p10 }
 0x145   : > { %p1377_p9 = pneg %p1376_p7 }
 0x147   : > { %p1382_p13 = pnand %p1381_p12, %p1377_p9 }
 0x149   : > { %1385 = shalt.err (!%p1382_p13)
}
 0x14a   : > { %1247 = dma.vmem_to_hbm [thread:$0]  (%p1533_p4), %s1807_s15, 256, %s1809_s16, %s1023_s26  }
 0x14b PF: > { %p1257_p0 = scmp.ge.s32.totalorder %s1440_s14, 2  ;;  %s1069_s20 = sand.u32 1, %s1420_s30  }
 0x14c   : > { %s1070_s27 = scalar_lea.sflag [#allocation3], %s1069_s20 }
 0x14d   : > { %p1251_p1 = pnand %p1257_p0, %p1540_p8 }
 0x14f   : > { %p1252_p2 = pneg %p1251_p1 }
 0x151   : > { %1411 = dma.done.wait (%p1252_p2), %s1070_s27, 256  }
 0x152   : > { %1413 = vsyncadd (%p1252_p2), %s1070_s27, 4294967040  ;;  %s1080_s0 = scalar_lea.sflag [#allocation5], %s1069_s20 }
 0x153   : > { %1415 = dma.done.wait (%p1252_p2), %s1080_s0, 256  }
 0x154   : > { %1417 = vsyncadd (%p1252_p2), %s1080_s0, 4294967040  ;;  %s26_s14 = sadd.s32 1, %s1440_s14   ;;  %s1878_s12 = sld [smem:[#allocation8_spill]] }
 0x155   : > { %p23_p3 = scmp.ge.s32.totalorder %s26_s14, 4   ;;  %s1879_s13 = sld [smem:[#allocation9_spill]] }
 0x156   : > { %s1880_s30 = smov %s1424_s10  ;;  %s1881_s10 = smov %s1428_s11 }
 0x157   : > { %s1882_s11 = smov %s1546_s22  ;;  %25 = sbr.rel (!%p23_p3) target bundleno = 9 (0x9), region = 128 }
 0x15c   :  { %1086 = vsyncpa [#allocation3], 1 }
 0x15d   :  { %1088 = vsyncpa [#allocation3 + $0x1], 1 }
 0x15e   :  { %1089 = vsyncpa [#allocation5], 1 }
 0x15f   :  { %1091 = vsyncpa [#allocation5 + $0x1], 1 }

</bundles_post_ra>
